<compile_context>
chip_gen: v5e
topology: v5e:2x2
jax: 0.10.0
libtpu: 0.0.40
codegen_flags: <defaults>
</compile_context>

<pallas_src>
import functools

import jax
import jax.numpy as jnp
from jax import lax
from jax.experimental import pallas as pl
from jax.experimental.pallas import tpu as pltpu

LANE = 128                        # conv output channels padded to one lane-dense slab
_VMEM_LIMIT = 32 * 1024 * 1024    # safe on v5e/v6e (128 MiB) and v7x (64 MiB VMEM/TC)


def _round_up(x, m):
    return ((x + m - 1) // m) * m


# --------------------------- implicit-GEMM conv kernel ---------------------------
def _conv_kernel(x_ref, w_ref, b_ref, o_ref, *, kp, ws, m_valid):
    """One batch image per grid step.

    x_ref: (1, Hs*Ws, Cs)   bf16  space-to-depth activation (VMEM resident)
    w_ref: (kp*kp, Cs, 128) bf16  per-(kh,kw) weight slices (constant index_map)
    b_ref: (1, 128)         f32
    o_ref: (1, OH*Ws, 128)  bf16  rows with ow >= OW are garbage (zeroed, sliced off)

    After space-to-depth the conv is stride 1, so the LHS for tap (kh, kw) is the
    contiguous slab x2[kh*Ws+kw : kh*Ws+kw+m_valid] -- no im2col materialization,
    no strided loads.  The (kh, kw) reduction is a short unrolled loop of MXU dots
    accumulated in f32.
    """
    acc = None
    for r in range(kp * kp):
        kh, kw = divmod(r, kp)
        lhs = x_ref[0, pl.ds(kh * ws + kw, m_valid), :]          # (m_valid, Cs) bf16
        part = jnp.dot(lhs, w_ref[r], preferred_element_type=jnp.float32)
        acc = part if acc is None else acc + part
    y = jnp.maximum(acc + b_ref[...], 0.0).astype(o_ref.dtype)
    o_ref[0, pl.ds(0, m_valid), :] = y
    tail = o_ref.shape[1] - m_valid
    if tail > 0:  # deterministic zeros in the (discarded) garbage rows
        o_ref[0, pl.ds(m_valid, tail), :] = jnp.zeros((tail, o_ref.shape[2]),
                                                      o_ref.dtype)


def _space_to_depth(x, s):
    """(B, H, W, C) -> (B, ceil(H/s), ceil(W/s), s*s*C), channel order (rh, rw, c)."""
    if s == 1:
        return x
    B, H, W, C = x.shape
    Hp, Wp = _round_up(H, s), _round_up(W, s)
    if (Hp, Wp) != (H, W):
        x = jnp.pad(x, ((0, 0), (0, Hp - H), (0, Wp - W), (0, 0)))
    x = x.reshape(B, Hp // s, s, Wp // s, s, C).transpose(0, 1, 3, 2, 4, 5)
    return x.reshape(B, Hp // s, Wp // s, s * s * C)


def conv2d_relu(x_std, w_std, b_pad, *, kp, oh, ow, oc):
    """Valid Conv2d + ReLU given the space-to-depth input.

    x_std: (B, Hs, Ws, Cs) bf16;  w_std: (kp*kp, Cs, 128) bf16;  b_pad: (128,) f32.
    Returns (B, oh, ow, oc) bf16.
    """
    B, hs, ws, cs = x_std.shape
    x2 = x_std.reshape(B, hs * ws, cs)
    oh_ws = oh * ws
    m_valid = oh_ws - (kp - 1)
    assert (kp - 1) * ws + (kp - 1) + m_valid <= hs * ws

    flops = 2 * B * m_valid * cs * LANE * kp * kp
    bytes_accessed = (x2.size * 2 + w_std.size * 2 + b_pad.size * 4
                      + B * oh_ws * LANE * 2)

    out = pl.pallas_call(
        functools.partial(_conv_kernel, kp=kp, ws=ws, m_valid=m_valid),
        out_shape=jax.ShapeDtypeStruct((B, oh_ws, LANE), jnp.bfloat16),
        grid=(B,),
        in_specs=[
            pl.BlockSpec((1, hs * ws, cs), lambda b: (b, 0, 0)),
            # Weights/bias: constant index_map -> fetched once, VMEM resident.
            # TODO(synk): pipeline_mode=pl.Buffered(1) would drop the second buffer of
            # these pinned blocks; they are <300 KB here so it is not needed yet.
            pl.BlockSpec((kp * kp, cs, LANE), lambda b: (0, 0, 0)),
            pl.BlockSpec((1, LANE), lambda b: (0, 0)),
        ],
        out_specs=pl.BlockSpec((1, oh_ws, LANE), lambda b: (b, 0, 0)),
        compiler_params=pltpu.CompilerParams(
            dimension_semantics=("parallel",),
            vmem_limit_bytes=_VMEM_LIMIT,
        ),
        cost_estimate=pl.CostEstimate(flops=int(flops), transcendentals=0,
                                      bytes_accessed=int(bytes_accessed)),
    )(x2, w_std, b_pad.reshape(1, LANE))
    # Drop the garbage columns (ow >= OW) and the zero-padded channel lanes.
    return out.reshape(B, oh, ws, LANE)[:, :, :ow, :oc]


# --------------------------- fused Linear+ReLU and heads --------------------------
def _mlp_heads_kernel(x_ref, w1_ref, b1_ref, w2_ref, b2_ref, o_ref, *, f_chunk):
    """out = relu(x @ W1 + b1) @ W2 + b2, f32 intermediate built in F-chunks."""
    x = x_ref[...].astype(w1_ref.dtype)              # no-op cast when fed bf16
    F = w1_ref.shape[1]
    acc = None
    for f0 in range(0, F, f_chunk):
        h = jnp.dot(x, w1_ref[:, pl.ds(f0, f_chunk)],
                    preferred_element_type=jnp.float32)
        h = jnp.maximum(h + b1_ref[:, pl.ds(f0, f_chunk)], 0.0)
        part = jnp.dot(h.astype(w2_ref.dtype), w2_ref[pl.ds(f0, f_chunk), :],
                       preferred_element_type=jnp.float32)
        acc = part if acc is None else acc + part
    o_ref[...] = (acc + b2_ref[...]).astype(o_ref.dtype)


def pallas_mlp_heads(x, w1, b1, w2, b2, *, tm=128):
    """Fused Linear(n_flatten->512)+ReLU and the concatenated action/value heads."""
    M, K = x.shape
    Kw, F = w1.shape
    Fw, N = w2.shape
    assert K == Kw and F == Fw

    if M <= 8:
        tm_eff, Mp = M, M                      # single block == full dim
    else:
        # >=2 grid programs so the parallel axis can shard across v7x's 2 TCs.
        tm_eff = min(tm, _round_up((M + 1) // 2, 8))
        Mp = _round_up(M, tm_eff)
        if Mp != M:
            x = jnp.pad(x, ((0, Mp - M), (0, 0)))

    f_chunk = 128 if F % 128 == 0 else F

    flops = 2 * Mp * F * (K + N)
    bytes_accessed = Mp * K * 2 + K * F * 2 + F * N * 2 + Mp * N * 4 + (F + N) * 4

    out = pl.pallas_call(
        functools.partial(_mlp_heads_kernel, f_chunk=f_chunk),
        out_shape=jax.ShapeDtypeStruct((Mp, N), jnp.float32),
        grid=(Mp // tm_eff,),
        in_specs=[
            pl.BlockSpec((tm_eff, K), lambda i: (i, 0)),
            pl.BlockSpec((K, F), lambda i: (0, 0)),
            pl.BlockSpec((1, F), lambda i: (0, 0)),
            pl.BlockSpec((F, N), lambda i: (0, 0)),
            pl.BlockSpec((1, N), lambda i: (0, 0)),
        ],
        out_specs=pl.BlockSpec((tm_eff, N), lambda i: (i, 0)),
        compiler_params=pltpu.CompilerParams(
            dimension_semantics=("parallel",),
            vmem_limit_bytes=_VMEM_LIMIT,
        ),
        cost_estimate=pl.CostEstimate(flops=int(flops), transcendentals=0,
                                      bytes_accessed=int(bytes_accessed)),
    )(x, w1, b1.reshape(1, F), w2, b2.reshape(1, N))
    return out[:M] if Mp != M else out


# ---------------------------------- Parameters ------------------------------------
def conv_out_hw(h, w):
    h1, w1 = (h - 8) // 4 + 1, (w - 8) // 4 + 1
    h2, w2 = (h1 - 4) // 2 + 1, (w1 - 4) // 2 + 1
    return h2 - 3 + 1, w2 - 3 + 1


def init_raw_params(key, n_actions, obs_hw):
    """PyTorch-layout parameters (Conv2d: OIHW; Linear: (out, in))."""
    h3, w3 = conv_out_hw(*obs_hw)
    n_flatten = 64 * h3 * w3
    ks = jax.random.split(key, 6)

    def w(k, shape, fan_in):
        return jax.random.normal(k, shape, jnp.float32) / jnp.sqrt(fan_in)

    return {
        "c1_w": w(ks[0], (32, 3, 8, 8), 3 * 8 * 8), "c1_b": jnp.zeros((32,), jnp.float32),
        "c2_w": w(ks[1], (64, 32, 4, 4), 32 * 4 * 4), "c2_b": jnp.zeros((64,), jnp.float32),
        "c3_w": w(ks[2], (64, 64, 3, 3), 64 * 3 * 3), "c3_b": jnp.zeros((64,), jnp.float32),
        "lin_w": w(ks[3], (512, n_flatten), n_flatten), "lin_b": jnp.zeros((512,), jnp.float32),
        "act_w": w(ks[4], (n_actions, 512), 512), "act_b": jnp.zeros((n_actions,), jnp.float32),
        "val_w": w(ks[5], (1, 512), 512), "val_b": jnp.zeros((1,), jnp.float32),
    }


def _conv_w_std(w, s, *, ocp=LANE):
    """(OC, IC, K, K) OIHW -> (kp*kp, s*s*IC, ocp) bf16 matching space-to-depth order."""
    OC, IC, K, _ = w.shape
    assert K % s == 0
    kp = K // s
    w6 = w.reshape(OC, IC, kp, s, kp, s)              # (oc, ic, kh', rh, kw', rw)
    w6 = jnp.transpose(w6, (2, 4, 3, 5, 1, 0))        # (kh', kw', rh, rw, ic, oc)
    wm = w6.reshape(kp * kp, s * s * IC, OC)
    wm = jnp.pad(wm, ((0, 0), (0, 0), (0, ocp - OC)))
    return wm.astype(jnp.bfloat16)


def prepare_params(raw, obs_hw):
    """Fold /255 into conv1, reorder for the space-to-depth layout, pad lanes, cast bf16."""
    h3, w3 = conv_out_hw(*obs_hw)
    p = {}
    p["c1_wm"] = _conv_w_std(raw["c1_w"] / 255.0, 4)   # /255 folded into conv1
    p["c2_wm"] = _conv_w_std(raw["c2_w"], 2)
    p["c3_wm"] = _conv_w_std(raw["c3_w"], 1)
    for name in ("c1", "c2", "c3"):
        b = raw[name + "_b"]
        p[name + "_bp"] = jnp.pad(b, (0, LANE - b.shape[0]))

    # Linear(n_flatten->512): PyTorch flattens NCHW (row index = (c, oh, ow));
    # reorder rows to the NHWC flatten order (oh, ow, c) used here.
    lw = raw["lin_w"].T                                      # (n_flatten, 512)
    lw = lw.reshape(64, h3, w3, 512).transpose(1, 2, 0, 3).reshape(64 * h3 * w3, 512)
    p["lin_wm"] = lw.astype(jnp.bfloat16)
    p["lin_b"] = raw["lin_b"]

    # Fused action+value heads: concat columns, pad to one 128-lane slab.
    hw = jnp.concatenate([raw["act_w"].T, raw["val_w"].T], axis=1)   # (512, A+1)
    hb = jnp.concatenate([raw["act_b"], raw["val_b"]], axis=0)       # (A+1,)
    p["head_wm"] = jnp.pad(hw, ((0, 0), (0, LANE - hw.shape[1]))).astype(jnp.bfloat16)
    p["head_bp"] = jnp.pad(hb, (0, LANE - hb.shape[0]))
    return p


# ---------------------------------- Forward pass ----------------------------------
def custom_policy_forward(params, obs, *, n_actions):
    """obs: (B, 3, H, W) f32 in [0, 255] (NCHW, as in PyTorch).
    Returns (logits (B, A), values (B, 1)) in f32."""
    B, _, H, W = obs.shape
    oh1, ow1 = (H - 8) // 4 + 1, (W - 8) // 4 + 1
    oh2, ow2 = (oh1 - 4) // 2 + 1, (ow1 - 4) // 2 + 1
    oh3, ow3 = oh2 - 2, ow2 - 2

    # NCHW -> NHWC, born bf16 (exact for integer pixel values); /255 lives in c1_wm.
    x = jnp.transpose(obs, (0, 2, 3, 1)).astype(jnp.bfloat16)
    x = _space_to_depth(x, 4)
    x = conv2d_relu(x, params["c1_wm"], params["c1_bp"], kp=2, oh=oh1, ow=ow1, oc=32)
    x = _space_to_depth(x, 2)
    x = conv2d_relu(x, params["c2_wm"], params["c2_bp"], kp=2, oh=oh2, ow=ow2, oc=64)
    x = conv2d_relu(x, params["c3_wm"], params["c3_bp"], kp=3, oh=oh3, ow=ow3, oc=64)

    feat_in = x.reshape(B, -1)                         # NHWC flatten (lin_wm reordered)
    head = pallas_mlp_heads(feat_in, params["lin_wm"], params["lin_b"],
                            params["head_wm"], params["head_bp"])      # (B, 128) f32
    return head[:, :n_actions], head[:, n_actions:n_actions + 1]


# ------------------------------ Pure-JAX reference --------------------------------
def reference_forward(raw, obs):
    """f32 reference mirroring the PyTorch module (for a tolerance check)."""
    def conv(x, w, b, s):
        y = lax.conv_general_dilated(x, w, (s, s), "VALID",
                                     dimension_numbers=("NCHW", "OIHW", "NCHW"))
        return jax.nn.relu(y + b[None, :, None, None])
    x = obs / 255.0
    x = conv(x, raw["c1_w"], raw["c1_b"], 4)
    x = conv(x, raw["c2_w"], raw["c2_b"], 2)
    x = conv(x, raw["c3_w"], raw["c3_b"], 1)
    feat = x.reshape(x.shape[0], -1)                        # NCHW flatten
    feat = jax.nn.relu(feat @ raw["lin_w"].T + raw["lin_b"])
    logits = feat @ raw["act_w"].T + raw["act_b"]
    values = feat @ raw["val_w"].T + raw["val_b"]
    return logits, values


# -------------------------------------- Main ---------------------------------------
if __name__ == "__main__":
    # Conv stack (k8/s4, k4/s2, k3/s1) needs H, W >= 36; use 36x36 -> n_flatten = 64.
    B, C, H, W = 2, 3, 36, 36
    N_ACTIONS = 6

    key = jax.random.PRNGKey(0)
    k_params, k_obs = jax.random.split(key)
    raw = init_raw_params(k_params, N_ACTIONS, (H, W))
    params = prepare_params(raw, (H, W))

    obs = jax.random.uniform(k_obs, (B, C, H, W), jnp.float32, 0.0, 255.0)

    fwd = jax.jit(functools.partial(custom_policy_forward, n_actions=N_ACTIONS))
    logits, values = jax.block_until_ready(fwd(params, obs))

    assert logits.shape == (B, N_ACTIONS), logits.shape
    assert values.shape == (B, 1), values.shape
    assert bool(jnp.all(jnp.isfinite(logits))) and bool(jnp.all(jnp.isfinite(values)))

    # Numerical check vs the f32 reference (bf16 activations/weights -> loose tolerance).
    ref_logits, ref_values = reference_forward(raw, obs)
    assert bool(jnp.allclose(logits, ref_logits, rtol=0.1, atol=0.05)), (
        float(jnp.max(jnp.abs(logits - ref_logits))))
    assert bool(jnp.allclose(values, ref_values, rtol=0.1, atol=0.05)), (
        float(jnp.max(jnp.abs(values - ref_values))))

    print("KERNEL_OK")
</pallas_src>

<mosaic_0001>
module attributes {stable_mosaic.version = 11 : i64} {
  func.func @_conv_kernel(%arg0: i32, %arg1: memref<1x81x48xbf16, #tpu.memory_space<vmem>>, %arg2: memref<4x48x128xbf16, #tpu.memory_space<vmem>>, %arg3: memref<1x128xf32, #tpu.memory_space<vmem>>, %arg4: memref<1x72x128xbf16, #tpu.memory_space<vmem>>) attributes {dimension_semantics = [#tpu.dimension_semantics<parallel>], iteration_bounds = array<i64: 2>, scalar_prefetch = 0 : i64, scratch_operands = 0 : i64, tpu.core_type = #tpu.core_type<tc>, window_params = [{transform_indices = @transform_0, window_bounds = array<i64: 1, 81, 48>}, {pipeline_mode = #tpu.pipeline_mode<synchronous>, transform_indices = @transform_1, window_bounds = array<i64: 4, 48, 128>}, {pipeline_mode = #tpu.pipeline_mode<synchronous>, transform_indices = @transform_2, window_bounds = array<i64: 1, 128>}, {transform_indices = @transform_3, window_bounds = array<i64: 1, 72, 128>}]} {
    %c0 = arith.constant 0 : index
    %c0_0 = arith.constant 0 : index
    %c0_1 = arith.constant 0 : index
    %0 = vector.load %arg1[%c0, %c0_0, %c0_1] : memref<1x81x48xbf16, #tpu.memory_space<vmem>>, vector<1x71x48xbf16>
    %1 = vector.shape_cast %0 : vector<1x71x48xbf16> to vector<71x48xbf16>
    %c0_2 = arith.constant 0 : index
    %c0_3 = arith.constant 0 : index
    %c0_4 = arith.constant 0 : index
    %2 = vector.load %arg2[%c0_2, %c0_3, %c0_4] : memref<4x48x128xbf16, #tpu.memory_space<vmem>>, vector<1x48x128xbf16>
    %3 = vector.shape_cast %2 : vector<1x48x128xbf16> to vector<48x128xbf16>
    %cst = arith.constant dense<0.000000e+00> : vector<71x128xf32>
    %4 = tpu.matmul %1, %3, %cst {dimension_numbers = #tpu.dot_dimension_numbers<[1], [0], [0], [1], [0, 0, 1, 1], [], []>} : vector<71x48xbf16>, vector<48x128xbf16>, vector<71x128xf32> -> vector<71x128xf32>
    %c0_5 = arith.constant 0 : index
    %c1 = arith.constant 1 : index
    %c0_6 = arith.constant 0 : index
    %5 = vector.load %arg1[%c0_5, %c1, %c0_6] : memref<1x81x48xbf16, #tpu.memory_space<vmem>>, vector<1x71x48xbf16>
    %6 = vector.shape_cast %5 : vector<1x71x48xbf16> to vector<71x48xbf16>
    %c1_7 = arith.constant 1 : index
    %c0_8 = arith.constant 0 : index
    %c0_9 = arith.constant 0 : index
    %7 = vector.load %arg2[%c1_7, %c0_8, %c0_9] : memref<4x48x128xbf16, #tpu.memory_space<vmem>>, vector<1x48x128xbf16>
    %8 = vector.shape_cast %7 : vector<1x48x128xbf16> to vector<48x128xbf16>
    %cst_10 = arith.constant dense<0.000000e+00> : vector<71x128xf32>
    %9 = tpu.matmul %6, %8, %cst_10 {dimension_numbers = #tpu.dot_dimension_numbers<[1], [0], [0], [1], [0, 0, 1, 1], [], []>} : vector<71x48xbf16>, vector<48x128xbf16>, vector<71x128xf32> -> vector<71x128xf32>
    %10 = arith.addf %4, %9 : vector<71x128xf32>
    %c0_11 = arith.constant 0 : index
    %c9 = arith.constant 9 : index
    %c0_12 = arith.constant 0 : index
    %11 = vector.load %arg1[%c0_11, %c9, %c0_12] : memref<1x81x48xbf16, #tpu.memory_space<vmem>>, vector<1x71x48xbf16>
    %12 = vector.shape_cast %11 : vector<1x71x48xbf16> to vector<71x48xbf16>
    %c2 = arith.constant 2 : index
    %c0_13 = arith.constant 0 : index
    %c0_14 = arith.constant 0 : index
    %13 = vector.load %arg2[%c2, %c0_13, %c0_14] : memref<4x48x128xbf16, #tpu.memory_space<vmem>>, vector<1x48x128xbf16>
    %14 = vector.shape_cast %13 : vector<1x48x128xbf16> to vector<48x128xbf16>
    %cst_15 = arith.constant dense<0.000000e+00> : vector<71x128xf32>
    %15 = tpu.matmul %12, %14, %cst_15 {dimension_numbers = #tpu.dot_dimension_numbers<[1], [0], [0], [1], [0, 0, 1, 1], [], []>} : vector<71x48xbf16>, vector<48x128xbf16>, vector<71x128xf32> -> vector<71x128xf32>
    %16 = arith.addf %10, %15 : vector<71x128xf32>
    %c0_16 = arith.constant 0 : index
    %c10 = arith.constant 10 : index
    %c0_17 = arith.constant 0 : index
    %17 = vector.load %arg1[%c0_16, %c10, %c0_17] : memref<1x81x48xbf16, #tpu.memory_space<vmem>>, vector<1x71x48xbf16>
    %18 = vector.shape_cast %17 : vector<1x71x48xbf16> to vector<71x48xbf16>
    %c3 = arith.constant 3 : index
    %c0_18 = arith.constant 0 : index
    %c0_19 = arith.constant 0 : index
    %19 = vector.load %arg2[%c3, %c0_18, %c0_19] : memref<4x48x128xbf16, #tpu.memory_space<vmem>>, vector<1x48x128xbf16>
    %20 = vector.shape_cast %19 : vector<1x48x128xbf16> to vector<48x128xbf16>
    %cst_20 = arith.constant dense<0.000000e+00> : vector<71x128xf32>
    %21 = tpu.matmul %18, %20, %cst_20 {dimension_numbers = #tpu.dot_dimension_numbers<[1], [0], [0], [1], [0, 0, 1, 1], [], []>} : vector<71x48xbf16>, vector<48x128xbf16>, vector<71x128xf32> -> vector<71x128xf32>
    %22 = arith.addf %16, %21 : vector<71x128xf32>
    %c0_21 = arith.constant 0 : index
    %c0_22 = arith.constant 0 : index
    %23 = vector.load %arg3[%c0_21, %c0_22] : memref<1x128xf32, #tpu.memory_space<vmem>>, vector<1x128xf32>
    %24 = vector.broadcast %23 : vector<1x128xf32> to vector<71x128xf32>
    %25 = arith.addf %22, %24 : vector<71x128xf32>
    %cst_23 = arith.constant 0.000000e+00 : f32
    %26 = vector.broadcast %cst_23 : f32 to vector<71x128xf32>
    %27 = arith.maximumf %25, %26 : vector<71x128xf32>
    %28 = arith.truncf %27 : vector<71x128xf32> to vector<71x128xbf16>
    %c0_24 = arith.constant 0 : index
    %c0_25 = arith.constant 0 : index
    %c0_26 = arith.constant 0 : index
    %29 = vector.load %arg4[%c0_24, %c0_25, %c0_26] : memref<1x72x128xbf16, #tpu.memory_space<vmem>>, vector<1x71x128xbf16>
    %30 = vector.shape_cast %29 : vector<1x71x128xbf16> to vector<71x128xbf16>
    %31 = vector.shape_cast %28 : vector<71x128xbf16> to vector<1x71x128xbf16>
    tpu.vector_store %arg4[%c0_24, %c0_25, %c0_26], %31 {strides = array<i32>} : memref<1x72x128xbf16, #tpu.memory_space<vmem>>, vector<1x71x128xbf16>,
    %cst_27 = arith.constant 0.000000e+00 : bf16
    %32 = vector.broadcast %cst_27 : bf16 to vector<1x128xbf16>
    %c0_28 = arith.constant 0 : index
    %c71 = arith.constant 71 : index
    %c0_29 = arith.constant 0 : index
    %33 = vector.load %arg4[%c0_28, %c71, %c0_29] : memref<1x72x128xbf16, #tpu.memory_space<vmem>>, vector<1x1x128xbf16>
    %34 = vector.shape_cast %33 : vector<1x1x128xbf16> to vector<1x128xbf16>
    %35 = vector.shape_cast %32 : vector<1x128xbf16> to vector<1x1x128xbf16>
    tpu.vector_store %arg4[%c0_28, %c71, %c0_29], %35 {strides = array<i32>} : memref<1x72x128xbf16, #tpu.memory_space<vmem>>, vector<1x1x128xbf16>,
    return
  }
  func.func @transform_0(%arg0: i32) -> (i32, i32, i32) {
    %c0_i32 = arith.constant 0 : i32
    %c0_i32_0 = arith.constant 0 : i32
    %c0_i32_1 = arith.constant 0 : i32
    return %arg0, %c0_i32, %c0_i32_0 : i32, i32, i32
  }
  func.func @transform_1(%arg0: i32) -> (i32, i32, i32) {
    %c0_i32 = arith.constant 0 : i32
    %c0_i32_0 = arith.constant 0 : i32
    %c0_i32_1 = arith.constant 0 : i32
    %c0_i32_2 = arith.constant 0 : i32
    return %c0_i32, %c0_i32_0, %c0_i32_1 : i32, i32, i32
  }
  func.func @transform_2(%arg0: i32) -> (i32, i32) {
    %c0_i32 = arith.constant 0 : i32
    %c0_i32_0 = arith.constant 0 : i32
    %c0_i32_1 = arith.constant 0 : i32
    return %c0_i32, %c0_i32_0 : i32, i32
  }
  func.func @transform_3(%arg0: i32) -> (i32, i32, i32) {
    %c0_i32 = arith.constant 0 : i32
    %c0_i32_0 = arith.constant 0 : i32
    %c0_i32_1 = arith.constant 0 : i32
    return %arg0, %c0_i32, %c0_i32_0 : i32, i32, i32
  }
}

module attributes {stable_mosaic.version = 11 : i64} {
  func.func @_conv_kernel(%arg0: i32, %arg1: memref<1x16x128xbf16, #tpu.memory_space<vmem>>, %arg2: memref<4x128x128xbf16, #tpu.memory_space<vmem>>, %arg3: memref<1x128xf32, #tpu.memory_space<vmem>>, %arg4: memref<1x12x128xbf16, #tpu.memory_space<vmem>>) attributes {dimension_semantics = [#tpu.dimension_semantics<parallel>], iteration_bounds = array<i64: 2>, scalar_prefetch = 0 : i64, scratch_operands = 0 : i64, tpu.core_type = #tpu.core_type<tc>, window_params = [{transform_indices = @transform_0, window_bounds = array<i64: 1, 16, 128>}, {pipeline_mode = #tpu.pipeline_mode<synchronous>, transform_indices = @transform_1, window_bounds = array<i64: 4, 128, 128>}, {pipeline_mode = #tpu.pipeline_mode<synchronous>, transform_indices = @transform_2, window_bounds = array<i64: 1, 128>}, {transform_indices = @transform_3, window_bounds = array<i64: 1, 12, 128>}]} {
    %c0 = arith.constant 0 : index
    %c0_0 = arith.constant 0 : index
    %c0_1 = arith.constant 0 : index
    %0 = vector.load %arg1[%c0, %c0_0, %c0_1] : memref<1x16x128xbf16, #tpu.memory_space<vmem>>, vector<1x11x128xbf16>
    %1 = vector.shape_cast %0 : vector<1x11x128xbf16> to vector<11x128xbf16>
    %c0_2 = arith.constant 0 : index
    %c0_3 = arith.constant 0 : index
    %c0_4 = arith.constant 0 : index
    %2 = vector.load %arg2[%c0_2, %c0_3, %c0_4] : memref<4x128x128xbf16, #tpu.memory_space<vmem>>, vector<1x128x128xbf16>
    %3 = vector.shape_cast %2 : vector<1x128x128xbf16> to vector<128x128xbf16>
    %cst = arith.constant dense<0.000000e+00> : vector<11x128xf32>
    %4 = tpu.matmul %1, %3, %cst {dimension_numbers = #tpu.dot_dimension_numbers<[1], [0], [0], [1], [0, 0, 1, 1], [], []>} : vector<11x128xbf16>, vector<128x128xbf16>, vector<11x128xf32> -> vector<11x128xf32>
    %c0_5 = arith.constant 0 : index
    %c1 = arith.constant 1 : index
    %c0_6 = arith.constant 0 : index
    %5 = vector.load %arg1[%c0_5, %c1, %c0_6] : memref<1x16x128xbf16, #tpu.memory_space<vmem>>, vector<1x11x128xbf16>
    %6 = vector.shape_cast %5 : vector<1x11x128xbf16> to vector<11x128xbf16>
    %c1_7 = arith.constant 1 : index
    %c0_8 = arith.constant 0 : index
    %c0_9 = arith.constant 0 : index
    %7 = vector.load %arg2[%c1_7, %c0_8, %c0_9] : memref<4x128x128xbf16, #tpu.memory_space<vmem>>, vector<1x128x128xbf16>
    %8 = vector.shape_cast %7 : vector<1x128x128xbf16> to vector<128x128xbf16>
    %cst_10 = arith.constant dense<0.000000e+00> : vector<11x128xf32>
    %9 = tpu.matmul %6, %8, %cst_10 {dimension_numbers = #tpu.dot_dimension_numbers<[1], [0], [0], [1], [0, 0, 1, 1], [], []>} : vector<11x128xbf16>, vector<128x128xbf16>, vector<11x128xf32> -> vector<11x128xf32>
    %10 = arith.addf %4, %9 : vector<11x128xf32>
    %c0_11 = arith.constant 0 : index
    %c4 = arith.constant 4 : index
    %c0_12 = arith.constant 0 : index
    %11 = vector.load %arg1[%c0_11, %c4, %c0_12] : memref<1x16x128xbf16, #tpu.memory_space<vmem>>, vector<1x11x128xbf16>
    %12 = vector.shape_cast %11 : vector<1x11x128xbf16> to vector<11x128xbf16>
    %c2 = arith.constant 2 : index
    %c0_13 = arith.constant 0 : index
    %c0_14 = arith.constant 0 : index
    %13 = vector.load %arg2[%c2, %c0_13, %c0_14] : memref<4x128x128xbf16, #tpu.memory_space<vmem>>, vector<1x128x128xbf16>
    %14 = vector.shape_cast %13 : vector<1x128x128xbf16> to vector<128x128xbf16>
    %cst_15 = arith.constant dense<0.000000e+00> : vector<11x128xf32>
    %15 = tpu.matmul %12, %14, %cst_15 {dimension_numbers = #tpu.dot_dimension_numbers<[1], [0], [0], [1], [0, 0, 1, 1], [], []>} : vector<11x128xbf16>, vector<128x128xbf16>, vector<11x128xf32> -> vector<11x128xf32>
    %16 = arith.addf %10, %15 : vector<11x128xf32>
    %c0_16 = arith.constant 0 : index
    %c5 = arith.constant 5 : index
    %c0_17 = arith.constant 0 : index
    %17 = vector.load %arg1[%c0_16, %c5, %c0_17] : memref<1x16x128xbf16, #tpu.memory_space<vmem>>, vector<1x11x128xbf16>
    %18 = vector.shape_cast %17 : vector<1x11x128xbf16> to vector<11x128xbf16>
    %c3 = arith.constant 3 : index
    %c0_18 = arith.constant 0 : index
    %c0_19 = arith.constant 0 : index
    %19 = vector.load %arg2[%c3, %c0_18, %c0_19] : memref<4x128x128xbf16, #tpu.memory_space<vmem>>, vector<1x128x128xbf16>
    %20 = vector.shape_cast %19 : vector<1x128x128xbf16> to vector<128x128xbf16>
    %cst_20 = arith.constant dense<0.000000e+00> : vector<11x128xf32>
    %21 = tpu.matmul %18, %20, %cst_20 {dimension_numbers = #tpu.dot_dimension_numbers<[1], [0], [0], [1], [0, 0, 1, 1], [], []>} : vector<11x128xbf16>, vector<128x128xbf16>, vector<11x128xf32> -> vector<11x128xf32>
    %22 = arith.addf %16, %21 : vector<11x128xf32>
    %c0_21 = arith.constant 0 : index
    %c0_22 = arith.constant 0 : index
    %23 = vector.load %arg3[%c0_21, %c0_22] : memref<1x128xf32, #tpu.memory_space<vmem>>, vector<1x128xf32>
    %24 = vector.broadcast %23 : vector<1x128xf32> to vector<11x128xf32>
    %25 = arith.addf %22, %24 : vector<11x128xf32>
    %cst_23 = arith.constant 0.000000e+00 : f32
    %26 = vector.broadcast %cst_23 : f32 to vector<11x128xf32>
    %27 = arith.maximumf %25, %26 : vector<11x128xf32>
    %28 = arith.truncf %27 : vector<11x128xf32> to vector<11x128xbf16>
    %c0_24 = arith.constant 0 : index
    %c0_25 = arith.constant 0 : index
    %c0_26 = arith.constant 0 : index
    %29 = vector.load %arg4[%c0_24, %c0_25, %c0_26] : memref<1x12x128xbf16, #tpu.memory_space<vmem>>, vector<1x11x128xbf16>
    %30 = vector.shape_cast %29 : vector<1x11x128xbf16> to vector<11x128xbf16>
    %31 = vector.shape_cast %28 : vector<11x128xbf16> to vector<1x11x128xbf16>
    tpu.vector_store %arg4[%c0_24, %c0_25, %c0_26], %31 {strides = array<i32>} : memref<1x12x128xbf16, #tpu.memory_space<vmem>>, vector<1x11x128xbf16>,
    %cst_27 = arith.constant 0.000000e+00 : bf16
    %32 = vector.broadcast %cst_27 : bf16 to vector<1x128xbf16>
    %c0_28 = arith.constant 0 : index
    %c11 = arith.constant 11 : index
    %c0_29 = arith.constant 0 : index
    %33 = vector.load %arg4[%c0_28, %c11, %c0_29] : memref<1x12x128xbf16, #tpu.memory_space<vmem>>, vector<1x1x128xbf16>
    %34 = vector.shape_cast %33 : vector<1x1x128xbf16> to vector<1x128xbf16>
    %35 = vector.shape_cast %32 : vector<1x128xbf16> to vector<1x1x128xbf16>
    tpu.vector_store %arg4[%c0_28, %c11, %c0_29], %35 {strides = array<i32>} : memref<1x12x128xbf16, #tpu.memory_space<vmem>>, vector<1x1x128xbf16>,
    return
  }
  func.func @transform_0(%arg0: i32) -> (i32, i32, i32) {
    %c0_i32 = arith.constant 0 : i32
    %c0_i32_0 = arith.constant 0 : i32
    %c0_i32_1 = arith.constant 0 : i32
    return %arg0, %c0_i32, %c0_i32_0 : i32, i32, i32
  }
  func.func @transform_1(%arg0: i32) -> (i32, i32, i32) {
    %c0_i32 = arith.constant 0 : i32
    %c0_i32_0 = arith.constant 0 : i32
    %c0_i32_1 = arith.constant 0 : i32
    %c0_i32_2 = arith.constant 0 : i32
    return %c0_i32, %c0_i32_0, %c0_i32_1 : i32, i32, i32
  }
  func.func @transform_2(%arg0: i32) -> (i32, i32) {
    %c0_i32 = arith.constant 0 : i32
    %c0_i32_0 = arith.constant 0 : i32
    %c0_i32_1 = arith.constant 0 : i32
    return %c0_i32, %c0_i32_0 : i32, i32
  }
  func.func @transform_3(%arg0: i32) -> (i32, i32, i32) {
    %c0_i32 = arith.constant 0 : i32
    %c0_i32_0 = arith.constant 0 : i32
    %c0_i32_1 = arith.constant 0 : i32
    return %arg0, %c0_i32, %c0_i32_0 : i32, i32, i32
  }
}

module attributes {stable_mosaic.version = 11 : i64} {
  func.func @_mlp_heads_kernel(%arg0: i32, %arg1: memref<2x64xbf16, #tpu.memory_space<vmem>>, %arg2: memref<64x512xbf16, #tpu.memory_space<vmem>>, %arg3: memref<1x512xf32, #tpu.memory_space<vmem>>, %arg4: memref<512x128xbf16, #tpu.memory_space<vmem>>, %arg5: memref<1x128xf32, #tpu.memory_space<vmem>>, %arg6: memref<2x128xf32, #tpu.memory_space<vmem>>) attributes {dimension_semantics = [#tpu.dimension_semantics<parallel>], iteration_bounds = array<i64: 1>, scalar_prefetch = 0 : i64, scratch_operands = 0 : i64, tpu.core_type = #tpu.core_type<tc>, window_params = [{transform_indices = @transform_0, window_bounds = array<i64: 2, 64>}, {pipeline_mode = #tpu.pipeline_mode<synchronous>, transform_indices = @transform_1, window_bounds = array<i64: 64, 512>}, {pipeline_mode = #tpu.pipeline_mode<synchronous>, transform_indices = @transform_2, window_bounds = array<i64: 1, 512>}, {pipeline_mode = #tpu.pipeline_mode<synchronous>, transform_indices = @transform_3, window_bounds = array<i64: 512, 128>}, {pipeline_mode = #tpu.pipeline_mode<synchronous>, transform_indices = @transform_4, window_bounds = array<i64: 1, 128>}, {transform_indices = @transform_5, window_bounds = array<i64: 2, 128>}]} {
    %c0 = arith.constant 0 : index
    %c0_0 = arith.constant 0 : index
    %0 = vector.load %arg1[%c0, %c0_0] : memref<2x64xbf16, #tpu.memory_space<vmem>>, vector<2x64xbf16>
    %c0_1 = arith.constant 0 : index
    %c0_2 = arith.constant 0 : index
    %1 = vector.load %arg2[%c0_1, %c0_2] : memref<64x512xbf16, #tpu.memory_space<vmem>>, vector<64x128xbf16>
    %cst = arith.constant dense<0.000000e+00> : vector<2x128xf32>
    %2 = tpu.matmul %0, %1, %cst {dimension_numbers = #tpu.dot_dimension_numbers<[1], [0], [0], [1], [0, 0, 1, 1], [], []>} : vector<2x64xbf16>, vector<64x128xbf16>, vector<2x128xf32> -> vector<2x128xf32>
    %c0_3 = arith.constant 0 : index
    %c0_4 = arith.constant 0 : index
    %3 = vector.load %arg3[%c0_3, %c0_4] : memref<1x512xf32, #tpu.memory_space<vmem>>, vector<1x128xf32>
    %4 = vector.broadcast %3 : vector<1x128xf32> to vector<2x128xf32>
    %5 = arith.addf %2, %4 : vector<2x128xf32>
    %cst_5 = arith.constant 0.000000e+00 : f32
    %6 = vector.broadcast %cst_5 : f32 to vector<2x128xf32>
    %7 = arith.maximumf %5, %6 : vector<2x128xf32>
    %8 = arith.truncf %7 : vector<2x128xf32> to vector<2x128xbf16>
    %c0_6 = arith.constant 0 : index
    %c0_7 = arith.constant 0 : index
    %9 = vector.load %arg4[%c0_6, %c0_7] : memref<512x128xbf16, #tpu.memory_space<vmem>>, vector<128x128xbf16>
    %cst_8 = arith.constant dense<0.000000e+00> : vector<2x128xf32>
    %10 = tpu.matmul %8, %9, %cst_8 {dimension_numbers = #tpu.dot_dimension_numbers<[1], [0], [0], [1], [0, 0, 1, 1], [], []>} : vector<2x128xbf16>, vector<128x128xbf16>, vector<2x128xf32> -> vector<2x128xf32>
    %c0_9 = arith.constant 0 : index
    %c128 = arith.constant 128 : index
    %11 = vector.load %arg2[%c0_9, %c128] : memref<64x512xbf16, #tpu.memory_space<vmem>>, vector<64x128xbf16>
    %cst_10 = arith.constant dense<0.000000e+00> : vector<2x128xf32>
    %12 = tpu.matmul %0, %11, %cst_10 {dimension_numbers = #tpu.dot_dimension_numbers<[1], [0], [0], [1], [0, 0, 1, 1], [], []>} : vector<2x64xbf16>, vector<64x128xbf16>, vector<2x128xf32> -> vector<2x128xf32>
    %c0_11 = arith.constant 0 : index
    %c128_12 = arith.constant 128 : index
    %13 = vector.load %arg3[%c0_11, %c128_12] : memref<1x512xf32, #tpu.memory_space<vmem>>, vector<1x128xf32>
    %14 = vector.broadcast %13 : vector<1x128xf32> to vector<2x128xf32>
    %15 = arith.addf %12, %14 : vector<2x128xf32>
    %cst_13 = arith.constant 0.000000e+00 : f32
    %16 = vector.broadcast %cst_13 : f32 to vector<2x128xf32>
    %17 = arith.maximumf %15, %16 : vector<2x128xf32>
    %18 = arith.truncf %17 : vector<2x128xf32> to vector<2x128xbf16>
    %c128_14 = arith.constant 128 : index
    %c0_15 = arith.constant 0 : index
    %19 = vector.load %arg4[%c128_14, %c0_15] : memref<512x128xbf16, #tpu.memory_space<vmem>>, vector<128x128xbf16>
    %cst_16 = arith.constant dense<0.000000e+00> : vector<2x128xf32>
    %20 = tpu.matmul %18, %19, %cst_16 {dimension_numbers = #tpu.dot_dimension_numbers<[1], [0], [0], [1], [0, 0, 1, 1], [], []>} : vector<2x128xbf16>, vector<128x128xbf16>, vector<2x128xf32> -> vector<2x128xf32>
    %21 = arith.addf %10, %20 : vector<2x128xf32>
    %c0_17 = arith.constant 0 : index
    %c256 = arith.constant 256 : index
    %22 = vector.load %arg2[%c0_17, %c256] : memref<64x512xbf16, #tpu.memory_space<vmem>>, vector<64x128xbf16>
    %cst_18 = arith.constant dense<0.000000e+00> : vector<2x128xf32>
    %23 = tpu.matmul %0, %22, %cst_18 {dimension_numbers = #tpu.dot_dimension_numbers<[1], [0], [0], [1], [0, 0, 1, 1], [], []>} : vector<2x64xbf16>, vector<64x128xbf16>, vector<2x128xf32> -> vector<2x128xf32>
    %c0_19 = arith.constant 0 : index
    %c256_20 = arith.constant 256 : index
    %24 = vector.load %arg3[%c0_19, %c256_20] : memref<1x512xf32, #tpu.memory_space<vmem>>, vector<1x128xf32>
    %25 = vector.broadcast %24 : vector<1x128xf32> to vector<2x128xf32>
    %26 = arith.addf %23, %25 : vector<2x128xf32>
    %cst_21 = arith.constant 0.000000e+00 : f32
    %27 = vector.broadcast %cst_21 : f32 to vector<2x128xf32>
    %28 = arith.maximumf %26, %27 : vector<2x128xf32>
    %29 = arith.truncf %28 : vector<2x128xf32> to vector<2x128xbf16>
    %c256_22 = arith.constant 256 : index
    %c0_23 = arith.constant 0 : index
    %30 = vector.load %arg4[%c256_22, %c0_23] : memref<512x128xbf16, #tpu.memory_space<vmem>>, vector<128x128xbf16>
    %cst_24 = arith.constant dense<0.000000e+00> : vector<2x128xf32>
    %31 = tpu.matmul %29, %30, %cst_24 {dimension_numbers = #tpu.dot_dimension_numbers<[1], [0], [0], [1], [0, 0, 1, 1], [], []>} : vector<2x128xbf16>, vector<128x128xbf16>, vector<2x128xf32> -> vector<2x128xf32>
    %32 = arith.addf %21, %31 : vector<2x128xf32>
    %c0_25 = arith.constant 0 : index
    %c384 = arith.constant 384 : index
    %33 = vector.load %arg2[%c0_25, %c384] : memref<64x512xbf16, #tpu.memory_space<vmem>>, vector<64x128xbf16>
    %cst_26 = arith.constant dense<0.000000e+00> : vector<2x128xf32>
    %34 = tpu.matmul %0, %33, %cst_26 {dimension_numbers = #tpu.dot_dimension_numbers<[1], [0], [0], [1], [0, 0, 1, 1], [], []>} : vector<2x64xbf16>, vector<64x128xbf16>, vector<2x128xf32> -> vector<2x128xf32>
    %c0_27 = arith.constant 0 : index
    %c384_28 = arith.constant 384 : index
    %35 = vector.load %arg3[%c0_27, %c384_28] : memref<1x512xf32, #tpu.memory_space<vmem>>, vector<1x128xf32>
    %36 = vector.broadcast %35 : vector<1x128xf32> to vector<2x128xf32>
    %37 = arith.addf %34, %36 : vector<2x128xf32>
    %cst_29 = arith.constant 0.000000e+00 : f32
    %38 = vector.broadcast %cst_29 : f32 to vector<2x128xf32>
    %39 = arith.maximumf %37, %38 : vector<2x128xf32>
    %40 = arith.truncf %39 : vector<2x128xf32> to vector<2x128xbf16>
    %c384_30 = arith.constant 384 : index
    %c0_31 = arith.constant 0 : index
    %41 = vector.load %arg4[%c384_30, %c0_31] : memref<512x128xbf16, #tpu.memory_space<vmem>>, vector<128x128xbf16>
    %cst_32 = arith.constant dense<0.000000e+00> : vector<2x128xf32>
    %42 = tpu.matmul %40, %41, %cst_32 {dimension_numbers = #tpu.dot_dimension_numbers<[1], [0], [0], [1], [0, 0, 1, 1], [], []>} : vector<2x128xbf16>, vector<128x128xbf16>, vector<2x128xf32> -> vector<2x128xf32>
    %43 = arith.addf %32, %42 : vector<2x128xf32>
    %c0_33 = arith.constant 0 : index
    %c0_34 = arith.constant 0 : index
    %44 = vector.load %arg5[%c0_33, %c0_34] : memref<1x128xf32, #tpu.memory_space<vmem>>, vector<1x128xf32>
    %45 = vector.broadcast %44 : vector<1x128xf32> to vector<2x128xf32>
    %46 = arith.addf %43, %45 : vector<2x128xf32>
    %c0_35 = arith.constant 0 : index
    %c0_36 = arith.constant 0 : index
    %47 = vector.load %arg6[%c0_35, %c0_36] : memref<2x128xf32, #tpu.memory_space<vmem>>, vector<2x128xf32>
    tpu.vector_store %arg6[%c0_35, %c0_36], %46 {strides = array<i32>} : memref<2x128xf32, #tpu.memory_space<vmem>>, vector<2x128xf32>,
    return
  }
  func.func @transform_0(%arg0: i32) -> (i32, i32) {
    %c0_i32 = arith.constant 0 : i32
    %c0_i32_0 = arith.constant 0 : i32
    return %arg0, %c0_i32 : i32, i32
  }
  func.func @transform_1(%arg0: i32) -> (i32, i32) {
    %c0_i32 = arith.constant 0 : i32
    %c0_i32_0 = arith.constant 0 : i32
    %c0_i32_1 = arith.constant 0 : i32
    return %c0_i32, %c0_i32_0 : i32, i32
  }
  func.func @transform_2(%arg0: i32) -> (i32, i32) {
    %c0_i32 = arith.constant 0 : i32
    %c0_i32_0 = arith.constant 0 : i32
    %c0_i32_1 = arith.constant 0 : i32
    return %c0_i32, %c0_i32_0 : i32, i32
  }
  func.func @transform_3(%arg0: i32) -> (i32, i32) {
    %c0_i32 = arith.constant 0 : i32
    %c0_i32_0 = arith.constant 0 : i32
    %c0_i32_1 = arith.constant 0 : i32
    return %c0_i32, %c0_i32_0 : i32, i32
  }
  func.func @transform_4(%arg0: i32) -> (i32, i32) {
    %c0_i32 = arith.constant 0 : i32
    %c0_i32_0 = arith.constant 0 : i32
    %c0_i32_1 = arith.constant 0 : i32
    return %c0_i32, %c0_i32_0 : i32, i32
  }
  func.func @transform_5(%arg0: i32) -> (i32, i32) {
    %c0_i32 = arith.constant 0 : i32
    %c0_i32_0 = arith.constant 0 : i32
    return %arg0, %c0_i32 : i32, i32
  }
}

module attributes {stable_mosaic.version = 11 : i64} {
  func.func @_conv_kernel(%arg0: i32, %arg1: memref<1x9x64xbf16, #tpu.memory_space<vmem>>, %arg2: memref<9x64x128xbf16, #tpu.memory_space<vmem>>, %arg3: memref<1x128xf32, #tpu.memory_space<vmem>>, %arg4: memref<1x3x128xbf16, #tpu.memory_space<vmem>>) attributes {dimension_semantics = [#tpu.dimension_semantics<parallel>], iteration_bounds = array<i64: 2>, scalar_prefetch = 0 : i64, scratch_operands = 0 : i64, tpu.core_type = #tpu.core_type<tc>, window_params = [{transform_indices = @transform_0, window_bounds = array<i64: 1, 9, 64>}, {pipeline_mode = #tpu.pipeline_mode<synchronous>, transform_indices = @transform_1, window_bounds = array<i64: 9, 64, 128>}, {pipeline_mode = #tpu.pipeline_mode<synchronous>, transform_indices = @transform_2, window_bounds = array<i64: 1, 128>}, {transform_indices = @transform_3, window_bounds = array<i64: 1, 3, 128>}]} {
    %c0 = arith.constant 0 : index
    %c0_0 = arith.constant 0 : index
    %c0_1 = arith.constant 0 : index
    %0 = vector.load %arg1[%c0, %c0_0, %c0_1] : memref<1x9x64xbf16, #tpu.memory_space<vmem>>, vector<1x1x64xbf16>
    %1 = vector.shape_cast %0 : vector<1x1x64xbf16> to vector<1x64xbf16>
    %c0_2 = arith.constant 0 : index
    %c0_3 = arith.constant 0 : index
    %c0_4 = arith.constant 0 : index
    %2 = vector.load %arg2[%c0_2, %c0_3, %c0_4] : memref<9x64x128xbf16, #tpu.memory_space<vmem>>, vector<1x64x128xbf16>
    %3 = vector.shape_cast %2 : vector<1x64x128xbf16> to vector<64x128xbf16>
    %cst = arith.constant dense<0.000000e+00> : vector<1x128xf32>
    %4 = tpu.matmul %1, %3, %cst {dimension_numbers = #tpu.dot_dimension_numbers<[1], [0], [0], [1], [0, 0, 1, 1], [], []>} : vector<1x64xbf16>, vector<64x128xbf16>, vector<1x128xf32> -> vector<1x128xf32>
    %c0_5 = arith.constant 0 : index
    %c1 = arith.constant 1 : index
    %c0_6 = arith.constant 0 : index
    %5 = vector.load %arg1[%c0_5, %c1, %c0_6] : memref<1x9x64xbf16, #tpu.memory_space<vmem>>, vector<1x1x64xbf16>
    %6 = vector.shape_cast %5 : vector<1x1x64xbf16> to vector<1x64xbf16>
    %c1_7 = arith.constant 1 : index
    %c0_8 = arith.constant 0 : index
    %c0_9 = arith.constant 0 : index
    %7 = vector.load %arg2[%c1_7, %c0_8, %c0_9] : memref<9x64x128xbf16, #tpu.memory_space<vmem>>, vector<1x64x128xbf16>
    %8 = vector.shape_cast %7 : vector<1x64x128xbf16> to vector<64x128xbf16>
    %cst_10 = arith.constant dense<0.000000e+00> : vector<1x128xf32>
    %9 = tpu.matmul %6, %8, %cst_10 {dimension_numbers = #tpu.dot_dimension_numbers<[1], [0], [0], [1], [0, 0, 1, 1], [], []>} : vector<1x64xbf16>, vector<64x128xbf16>, vector<1x128xf32> -> vector<1x128xf32>
    %10 = arith.addf %4, %9 : vector<1x128xf32>
    %c0_11 = arith.constant 0 : index
    %c2 = arith.constant 2 : index
    %c0_12 = arith.constant 0 : index
    %11 = vector.load %arg1[%c0_11, %c2, %c0_12] : memref<1x9x64xbf16, #tpu.memory_space<vmem>>, vector<1x1x64xbf16>
    %12 = vector.shape_cast %11 : vector<1x1x64xbf16> to vector<1x64xbf16>
    %c2_13 = arith.constant 2 : index
    %c0_14 = arith.constant 0 : index
    %c0_15 = arith.constant 0 : index
    %13 = vector.load %arg2[%c2_13, %c0_14, %c0_15] : memref<9x64x128xbf16, #tpu.memory_space<vmem>>, vector<1x64x128xbf16>
    %14 = vector.shape_cast %13 : vector<1x64x128xbf16> to vector<64x128xbf16>
    %cst_16 = arith.constant dense<0.000000e+00> : vector<1x128xf32>
    %15 = tpu.matmul %12, %14, %cst_16 {dimension_numbers = #tpu.dot_dimension_numbers<[1], [0], [0], [1], [0, 0, 1, 1], [], []>} : vector<1x64xbf16>, vector<64x128xbf16>, vector<1x128xf32> -> vector<1x128xf32>
    %16 = arith.addf %10, %15 : vector<1x128xf32>
    %c0_17 = arith.constant 0 : index
    %c3 = arith.constant 3 : index
    %c0_18 = arith.constant 0 : index
    %17 = vector.load %arg1[%c0_17, %c3, %c0_18] : memref<1x9x64xbf16, #tpu.memory_space<vmem>>, vector<1x1x64xbf16>
    %18 = vector.shape_cast %17 : vector<1x1x64xbf16> to vector<1x64xbf16>
    %c3_19 = arith.constant 3 : index
    %c0_20 = arith.constant 0 : index
    %c0_21 = arith.constant 0 : index
    %19 = vector.load %arg2[%c3_19, %c0_20, %c0_21] : memref<9x64x128xbf16, #tpu.memory_space<vmem>>, vector<1x64x128xbf16>
    %20 = vector.shape_cast %19 : vector<1x64x128xbf16> to vector<64x128xbf16>
    %cst_22 = arith.constant dense<0.000000e+00> : vector<1x128xf32>
    %21 = tpu.matmul %18, %20, %cst_22 {dimension_numbers = #tpu.dot_dimension_numbers<[1], [0], [0], [1], [0, 0, 1, 1], [], []>} : vector<1x64xbf16>, vector<64x128xbf16>, vector<1x128xf32> -> vector<1x128xf32>
    %22 = arith.addf %16, %21 : vector<1x128xf32>
    %c0_23 = arith.constant 0 : index
    %c4 = arith.constant 4 : index
    %c0_24 = arith.constant 0 : index
    %23 = vector.load %arg1[%c0_23, %c4, %c0_24] : memref<1x9x64xbf16, #tpu.memory_space<vmem>>, vector<1x1x64xbf16>
    %24 = vector.shape_cast %23 : vector<1x1x64xbf16> to vector<1x64xbf16>
    %c4_25 = arith.constant 4 : index
    %c0_26 = arith.constant 0 : index
    %c0_27 = arith.constant 0 : index
    %25 = vector.load %arg2[%c4_25, %c0_26, %c0_27] : memref<9x64x128xbf16, #tpu.memory_space<vmem>>, vector<1x64x128xbf16>
    %26 = vector.shape_cast %25 : vector<1x64x128xbf16> to vector<64x128xbf16>
    %cst_28 = arith.constant dense<0.000000e+00> : vector<1x128xf32>
    %27 = tpu.matmul %24, %26, %cst_28 {dimension_numbers = #tpu.dot_dimension_numbers<[1], [0], [0], [1], [0, 0, 1, 1], [], []>} : vector<1x64xbf16>, vector<64x128xbf16>, vector<1x128xf32> -> vector<1x128xf32>
    %28 = arith.addf %22, %27 : vector<1x128xf32>
    %c0_29 = arith.constant 0 : index
    %c5 = arith.constant 5 : index
    %c0_30 = arith.constant 0 : index
    %29 = vector.load %arg1[%c0_29, %c5, %c0_30] : memref<1x9x64xbf16, #tpu.memory_space<vmem>>, vector<1x1x64xbf16>
    %30 = vector.shape_cast %29 : vector<1x1x64xbf16> to vector<1x64xbf16>
    %c5_31 = arith.constant 5 : index
    %c0_32 = arith.constant 0 : index
    %c0_33 = arith.constant 0 : index
    %31 = vector.load %arg2[%c5_31, %c0_32, %c0_33] : memref<9x64x128xbf16, #tpu.memory_space<vmem>>, vector<1x64x128xbf16>
    %32 = vector.shape_cast %31 : vector<1x64x128xbf16> to vector<64x128xbf16>
    %cst_34 = arith.constant dense<0.000000e+00> : vector<1x128xf32>
    %33 = tpu.matmul %30, %32, %cst_34 {dimension_numbers = #tpu.dot_dimension_numbers<[1], [0], [0], [1], [0, 0, 1, 1], [], []>} : vector<1x64xbf16>, vector<64x128xbf16>, vector<1x128xf32> -> vector<1x128xf32>
    %34 = arith.addf %28, %33 : vector<1x128xf32>
    %c0_35 = arith.constant 0 : index
    %c6 = arith.constant 6 : index
    %c0_36 = arith.constant 0 : index
    %35 = vector.load %arg1[%c0_35, %c6, %c0_36] : memref<1x9x64xbf16, #tpu.memory_space<vmem>>, vector<1x1x64xbf16>
    %36 = vector.shape_cast %35 : vector<1x1x64xbf16> to vector<1x64xbf16>
    %c6_37 = arith.constant 6 : index
    %c0_38 = arith.constant 0 : index
    %c0_39 = arith.constant 0 : index
    %37 = vector.load %arg2[%c6_37, %c0_38, %c0_39] : memref<9x64x128xbf16, #tpu.memory_space<vmem>>, vector<1x64x128xbf16>
    %38 = vector.shape_cast %37 : vector<1x64x128xbf16> to vector<64x128xbf16>
    %cst_40 = arith.constant dense<0.000000e+00> : vector<1x128xf32>
    %39 = tpu.matmul %36, %38, %cst_40 {dimension_numbers = #tpu.dot_dimension_numbers<[1], [0], [0], [1], [0, 0, 1, 1], [], []>} : vector<1x64xbf16>, vector<64x128xbf16>, vector<1x128xf32> -> vector<1x128xf32>
    %40 = arith.addf %34, %39 : vector<1x128xf32>
    %c0_41 = arith.constant 0 : index
    %c7 = arith.constant 7 : index
    %c0_42 = arith.constant 0 : index
    %41 = vector.load %arg1[%c0_41, %c7, %c0_42] : memref<1x9x64xbf16, #tpu.memory_space<vmem>>, vector<1x1x64xbf16>
    %42 = vector.shape_cast %41 : vector<1x1x64xbf16> to vector<1x64xbf16>
    %c7_43 = arith.constant 7 : index
    %c0_44 = arith.constant 0 : index
    %c0_45 = arith.constant 0 : index
    %43 = vector.load %arg2[%c7_43, %c0_44, %c0_45] : memref<9x64x128xbf16, #tpu.memory_space<vmem>>, vector<1x64x128xbf16>
    %44 = vector.shape_cast %43 : vector<1x64x128xbf16> to vector<64x128xbf16>
    %cst_46 = arith.constant dense<0.000000e+00> : vector<1x128xf32>
    %45 = tpu.matmul %42, %44, %cst_46 {dimension_numbers = #tpu.dot_dimension_numbers<[1], [0], [0], [1], [0, 0, 1, 1], [], []>} : vector<1x64xbf16>, vector<64x128xbf16>, vector<1x128xf32> -> vector<1x128xf32>
    %46 = arith.addf %40, %45 : vector<1x128xf32>
    %c0_47 = arith.constant 0 : index
    %c8 = arith.constant 8 : index
    %c0_48 = arith.constant 0 : index
    %47 = vector.load %arg1[%c0_47, %c8, %c0_48] : memref<1x9x64xbf16, #tpu.memory_space<vmem>>, vector<1x1x64xbf16>
    %48 = vector.shape_cast %47 : vector<1x1x64xbf16> to vector<1x64xbf16>
    %c8_49 = arith.constant 8 : index
    %c0_50 = arith.constant 0 : index
    %c0_51 = arith.constant 0 : index
    %49 = vector.load %arg2[%c8_49, %c0_50, %c0_51] : memref<9x64x128xbf16, #tpu.memory_space<vmem>>, vector<1x64x128xbf16>
    %50 = vector.shape_cast %49 : vector<1x64x128xbf16> to vector<64x128xbf16>
    %cst_52 = arith.constant dense<0.000000e+00> : vector<1x128xf32>
    %51 = tpu.matmul %48, %50, %cst_52 {dimension_numbers = #tpu.dot_dimension_numbers<[1], [0], [0], [1], [0, 0, 1, 1], [], []>} : vector<1x64xbf16>, vector<64x128xbf16>, vector<1x128xf32> -> vector<1x128xf32>
    %52 = arith.addf %46, %51 : vector<1x128xf32>
    %c0_53 = arith.constant 0 : index
    %c0_54 = arith.constant 0 : index
    %53 = vector.load %arg3[%c0_53, %c0_54] : memref<1x128xf32, #tpu.memory_space<vmem>>, vector<1x128xf32>
    %54 = arith.addf %52, %53 : vector<1x128xf32>
    %cst_55 = arith.constant 0.000000e+00 : f32
    %55 = vector.broadcast %cst_55 : f32 to vector<1x128xf32>
    %56 = arith.maximumf %54, %55 : vector<1x128xf32>
    %57 = arith.truncf %56 : vector<1x128xf32> to vector<1x128xbf16>
    %c0_56 = arith.constant 0 : index
    %c0_57 = arith.constant 0 : index
    %c0_58 = arith.constant 0 : index
    %58 = vector.load %arg4[%c0_56, %c0_57, %c0_58] : memref<1x3x128xbf16, #tpu.memory_space<vmem>>, vector<1x1x128xbf16>
    %59 = vector.shape_cast %58 : vector<1x1x128xbf16> to vector<1x128xbf16>
    %60 = vector.shape_cast %57 : vector<1x128xbf16> to vector<1x1x128xbf16>
    tpu.vector_store %arg4[%c0_56, %c0_57, %c0_58], %60 {strides = array<i32>} : memref<1x3x128xbf16, #tpu.memory_space<vmem>>, vector<1x1x128xbf16>,
    %cst_59 = arith.constant 0.000000e+00 : bf16
    %61 = vector.broadcast %cst_59 : bf16 to vector<2x128xbf16>
    %c0_60 = arith.constant 0 : index
    %c1_61 = arith.constant 1 : index
    %c0_62 = arith.constant 0 : index
    %62 = vector.load %arg4[%c0_60, %c1_61, %c0_62] : memref<1x3x128xbf16, #tpu.memory_space<vmem>>, vector<1x2x128xbf16>
    %63 = vector.shape_cast %62 : vector<1x2x128xbf16> to vector<2x128xbf16>
    %64 = vector.shape_cast %61 : vector<2x128xbf16> to vector<1x2x128xbf16>
    tpu.vector_store %arg4[%c0_60, %c1_61, %c0_62], %64 {strides = array<i32>} : memref<1x3x128xbf16, #tpu.memory_space<vmem>>, vector<1x2x128xbf16>,
    return
  }
  func.func @transform_0(%arg0: i32) -> (i32, i32, i32) {
    %c0_i32 = arith.constant 0 : i32
    %c0_i32_0 = arith.constant 0 : i32
    %c0_i32_1 = arith.constant 0 : i32
    return %arg0, %c0_i32, %c0_i32_0 : i32, i32, i32
  }
  func.func @transform_1(%arg0: i32) -> (i32, i32, i32) {
    %c0_i32 = arith.constant 0 : i32
    %c0_i32_0 = arith.constant 0 : i32
    %c0_i32_1 = arith.constant 0 : i32
    %c0_i32_2 = arith.constant 0 : i32
    return %c0_i32, %c0_i32_0, %c0_i32_1 : i32, i32, i32
  }
  func.func @transform_2(%arg0: i32) -> (i32, i32) {
    %c0_i32 = arith.constant 0 : i32
    %c0_i32_0 = arith.constant 0 : i32
    %c0_i32_1 = arith.constant 0 : i32
    return %c0_i32, %c0_i32_0 : i32, i32
  }
  func.func @transform_3(%arg0: i32) -> (i32, i32, i32) {
    %c0_i32 = arith.constant 0 : i32
    %c0_i32_0 = arith.constant 0 : i32
    %c0_i32_1 = arith.constant 0 : i32
    return %arg0, %c0_i32, %c0_i32_0 : i32, i32, i32
  }
}

</mosaic_0001>

<bundles_post_ra>
// kernel: custom_policy_forward.4
= control target key start
LH: loop header
LB: loop body
LE: loop exit
PB: predicated region body
PF: predicated region fallthrough
CT: control target
= control target key end

     0   :  { %s1005_s12 = smov 0   ;;  %s1136_s0 = inlined_call_operand.vmem [shape: bf16[2,81,48], index: 0, kind: input, shape index: {}]   ;;  %s1137_s1 = inlined_call_operand.vmem [shape: bf16[4,48,128], index: 1, kind: input, shape index: {}]   ;;  %s1138_s2 = inlined_call_operand.vmem [shape: f32[1,128], index: 2, kind: input, shape index: {}]   ;;  %s1139_s3 = inlined_call_operand.vmem [shape: bf16[2,72,128], index: 3, kind: output, shape index: {}]  }
   0x1 LB: > { %s771_s13 = sadd.s32 4294967295, %s983_s12   ;;  %p775_p0 = scmp.ge.s32.totalorder %s983_s12, 1  ;;  %s983_s12 = sphi %s1005_s12, %s13_s12  }
   0x2   : > { %p137_p1 = scmp.lt.s32.totalorder %s983_s12, 3 }
   0x4   : > { %p138_p2 = pnand %p775_p0, %p137_p1 }
   0x5   : > { %p161_p3 = scmp.lt.s32.totalorder (!%p138_p2), %s771_s13, 1 }
   0x6   : > { %141 = sbr.rel (%p138_p2) target bundleno = 242 (0xf2), region = 32 }
   0xb   : > { %v924_v0 = vld [vmem:[%s1137_s1 + $0x10] sm:$0xff]  ;;  %v942_v1 = vld [vmem:[%s1137_s1 + $0x58] sm:$0xff]  ;;  %v927_v2 = vld [vmem:[%s1137_s1 + $0x28] sm:$0xff]  ;;  %s1141_s13 = smov (!%p161_p3, %s771_s13), 1  ;;  %vm580_vm0 = vcmask 1046528   ;;  %vm275_vm1 = vcmask 392192  }
   0xc   : > { %v934_v3 = vld [vmem:[%s1137_s1 + $0x40] sm:$0xff]  ;;  %357 = vmatpush.bf16.msra.mxu1 %v924_v0  ;;  %628 = vmatpush.bf16.msra.mxu3 %v942_v1  ;;  %v923_v4 = vld [vmem:[%s1137_s1 + $0x8] sm:$0xff]  ;;  %v941_v5 = vld [vmem:[%s1137_s1 + $0x50] sm:$0xff]  ;;  %s966_s30 = smul.u32 44, %s1141_s13  ;;  %vm217_vm2 = vsmask.f32 7424 }
   0xd   : > { %296 = vmatpush.bf16.msra.mxu0 %v927_v2  ;;  %501 = vmatpush.bf16.msra.mxu2 %v934_v3  ;;  %v926_v6 = vld [vmem:[%s1137_s1 + $0x20] sm:$0xff]  ;;  %v933_v7 = vld [vmem:[%s1137_s1 + $0x38] sm:$0xff]  ;;  %v940_v9 = vld [vmem:[%s1137_s1 + $0x48] sm:$0xff]  ;;  %s967_s19 = smul.u32 36, %s1141_s13  ;;  %vm704_vm3 = vcmask 1043456   ;;  %vm710_vm6 = vcmask 1043459  }
   0xe   : > { %v922_v8 = vld [vmem:[%s1137_s1] sm:$0xff]  ;;  %v925_v10 = vld [vmem:[%s1137_s1 + $0x18] sm:$0xff]  ;;  %s1052_s14 = scalar_lea.vmem %s1136_s0, %s966_s30  ;;  %v932_v11 = vld [vmem:[%s1137_s1 + $0x30] sm:$0xff]  ;;  %vm705_vm4 = vsmask.f32 3328 }
   0xf   : > { %v918_v12 = vld [vmem:[%s1052_s14] sm:$0xff]  ;;  %v935_v14 = vld [vmem:[%s1052_s14 + $0x4] sm:$0xf0]  ;;  %v936_v15 = vld [vmem:[%s1052_s14 + $0xc] sm:$0xff]  ;;  %s1116_s22 = scalar_lea.vmem %s1139_s3, %s967_s19  ;;  %vm711_vm7 = vsmask.f32 7950 }
  0x10   : > { %358 = vmatpush.bf16.msra.mxu1 %v923_v4  ;;  %629 = vmatpush.bf16.msra.mxu3 %v941_v5  ;;  %v881_v13 = vld [vmem:[%s1052_s14 + $0x4] sm:$0xe]  ;;  %v919_v17 = vld [vmem:[%s1052_s14 + $0x8] sm:$0xff]  ;;  %v221_v19 = vshll.u32 %v918_v12, 16  ;;  %v219_v20 = vshrl.u32 %v918_v12, 16  ;;  %v582_v23 = vrot.slane %v936_v15, 1  ;;  %vm706_vm5 = vmand %vm704_vm3, %vm705_vm4 }
  0x11   : > { %297 = vmatpush.bf16.msra.mxu0 %v926_v6  ;;  %502 = vmatpush.bf16.msra.mxu2 %v933_v7  ;;  %v882_v16 = vor.u32 %v935_v14, %v881_v13  ;;  %v928_v18 = vld [vmem:[%s1052_s14 + $0x4] sm:$0xff]  ;;  %v929_v21 = vld [vmem:[%s1052_s14 + $0xc] sm:$0xff]  ;;  %v226_v24 = vshll.u32 %v919_v17, 16  ;;  %v937_v38 = vld [vmem:[%s1052_s14 + $0x14] sm:$0xff]  ;;  %v230_v40 = vshrl.u32 %v919_v17, 16 }
  0x12   : > { %v223_v25 = vrot.slane %v221_v19, 1  ;;  %v425_v26 = vshrl.u32 %v928_v18, 16  ;;  %v427_v27 = vshll.u32 %v928_v18, 16  ;;  %v432_v28 = vshll.u32 %v929_v21, 16  ;;  %v920_v37 = vld [vmem:[%s1052_s14 + $0x10] sm:$0xff]  ;;  %v921_v52 = vld [vmem:[%s1052_s14 + $0x18] sm:$0xff]  ;;  %vm712_vm8 = vmand %vm710_vm6, %vm711_vm7 }
  0x13   : > { %v581_v22 = vrot.slane %v882_v16, 1  ;;  %v228_v30 = vrot.slane %v226_v24, 1  ;;  %v930_v39 = vld [vmem:[%s1052_s14 + $0x14] sm:$0xff]  ;;  %v234_v41 = vshll.u32 %v920_v37, 16  ;;  %v584_v42 = vrot.slane %v937_v38, 1  ;;  %v938_v53 = vld [vmem:[%s1052_s14 + $0x1c] sm:$0xff] }
  0x14   : > { %359 = vmatpush.bf16.msra.mxu1 %v922_v8  ;;  %630 = vmatpush.bf16.msra.mxu3 %v940_v9  ;;  %v224_v31 = vor.u32 %v223_v25, %v219_v20  ;;  %v429_v32 = vrot.slane %v427_v27, 1  ;;  %v434_v33 = vrot.slane %v432_v28, 1  ;;  %v436_v43 = vshrl.u32 %v929_v21, 16  ;;  %v931_v54 = vld [vmem:[%s1052_s14 + $0x1c] sm:$0xff]  ;;  %v897_v5 = vld [vmem:[%s1052_s14 + $0x24] sm:$0xf] }
  0x15   : > { %298 = vmatpush.bf16.msra.mxu0 %v925_v10  ;;  %503 = vmatpush.bf16.msra.mxu2 %v932_v11  ;;  %v583_v29 = vsel %vm580_vm0, %v581_v22, %v582_v23  ;;  %v440_v44 = vshll.u32 %v930_v39, 16  ;;  %v232_v45 = vor.u32 %v230_v40, %v228_v30  ;;  %v236_v46 = vrot.slane %v234_v41, 1  ;;  %v180_v63 = vld [vmem:[%s1052_s14 + $0x20] sm:$0xff]   ;;  %v939_v6 = vld [vmem:[%s1052_s14 + $0x24] sm:$0x10] }
  0x16   : > { %v229_v34 = vsel %vm217_vm2, %v224_v31, %v228_v30  ;;  %v430_v35 = vor.u32 %v429_v32, %v425_v26  ;;  %v585_v47 = vsel %vm580_vm0, %v582_v23, %v584_v42  ;;  %v438_v48 = vor.u32 %v436_v43, %v434_v33  ;;  %v1108_v38 = vld [vmem:[%s1138_s2] ss:$0 sm:$0xff] }
  0x17   : > { %829 = vmatmul.msk.bf16.vlgmr.msra.gmra.mxu1 %vm275_vm1, %v918_v12  ;;  %911 = vmatmul.msk.bf16.vlgmr.msra.gmra.mxu3 %vm275_vm1, %v583_v29  ;;  %v442_v49 = vrot.slane %v440_v44, 1  ;;  %v237_v50 = vsel %vm217_vm2, %v232_v45, %v236_v46  ;;  %v238_v55 = vshrl.u32 %v920_v37, 16  ;;  %v242_v56 = vshll.u32 %v921_v52, 16 }
  0x18   : > { %812 = vmatmul.msk.bf16.vlgmr.msra.gmra.mxu0 %vm275_vm1, %v229_v34  ;;  %v435_v36 = vsel %vm217_vm2, %v430_v35, %v434_v33  ;;  %v586_v57 = vrot.slane %v938_v53, 1  ;;  %v444_v58 = vshrl.u32 %v930_v39, 16  ;;  %v448_v59 = vshll.u32 %v931_v54, 16 }
  0x19   : > { %868 = vmatmul.msk.bf16.vlgmr.msra.gmra.mxu2 %vm275_vm1, %v435_v36  ;;  %v443_v51 = vsel %vm217_vm2, %v438_v48, %v442_v49  ;;  %v240_v60 = vor.u32 %v238_v55, %v236_v46  ;;  %v244_v61 = vrot.slane %v242_v56, 1  ;;  %v211_v3 = vunpack.c.l.b16 %v180_v63 }
  0x1a   : > { %v587_v62 = vsel %vm580_vm0, %v584_v42, %v586_v57  ;;  %v446_v0 = vor.u32 %v444_v58, %v442_v49  ;;  %v450_v1 = vrot.slane %v448_v59, 1  ;;  %v418_v7 = vunpack.c.h.b16 %v180_v63 }
  0x1b   : > { %v245_v2 = vsel %vm217_vm2, %v240_v60, %v244_v61  ;;  %v216_v8 = vpack.c.b16 %v211_v3, %v211_v3  ;;  %v898_v9 = vor.u32 %v939_v6, %v897_v5  ;;  %v246_v11 = vshrl.u32 %v921_v52, 16 }
  0x1c   : > { %v451_v4 = vsel %vm217_vm2, %v446_v0, %v450_v1  ;;  %v423_v10 = vpack.c.b16 %v418_v7, %v418_v7  ;;  %v452_v14 = vshrl.u32 %v931_v54, 16 }
  0x1d   : > { %v250_v12 = vshll.u32 %v216_v8, 16  ;;  %v588_v13 = vrot.slane %v898_v9, 1  ;;  %v248_v16 = vor.u32 %v246_v11, %v244_v61  ;;  %v254_v23 = vshrl.u32 %v216_v8, 16 }
  0x1e   : > { %v456_v15 = vshll.u32 %v423_v10, 16  ;;  %v454_v19 = vor.u32 %v452_v14, %v450_v1  ;;  %v460_v24 = vshrl.u32 %v423_v10, 16 }
  0x1f   : > { %v589_v18 = vsel %vm580_vm0, %v586_v57, %v588_v13 }
  0x20   : > { %v458_v20 = vrot.slane %v456_v15, 1 }
  0x22   : > { %v459_v22 = vsel %vm217_vm2, %v454_v19, %v458_v20  ;;  %v462_v26 = vor.u32 %v460_v24, %v458_v20 }
  0x27   : > { %830 = vmatmul.msk.bf16.gmra.mxu1 %vm275_vm1, %v919_v17  ;;  %912 = vmatmul.msk.bf16.gmra.mxu3 %vm275_vm1, %v585_v47  ;;  %v252_v17 = vrot.slane %v250_v12, 1 }
  0x28   : > { %813 = vmatmul.msk.bf16.gmra.mxu0 %vm275_vm1, %v237_v50 }
  0x29   : > { %869 = vmatmul.msk.bf16.gmra.mxu2 %vm275_vm1, %v443_v51  ;;  %v253_v21 = vsel %vm217_vm2, %v248_v16, %v252_v17  ;;  %v256_v25 = vor.u32 %v254_v23, %v252_v17 }
  0x37   : > { %831 = vmatmul.msk.bf16.gmra.mxu1 %vm275_vm1, %v920_v37  ;;  %913 = vmatmul.msk.bf16.gmra.mxu3 %vm275_vm1, %v587_v62 }
  0x38   : > { %814 = vmatmul.msk.bf16.gmra.mxu0 %vm275_vm1, %v245_v2 }
  0x39   : > { %870 = vmatmul.msk.bf16.gmra.mxu2 %vm275_vm1, %v451_v4 }
  0x47   : > { %832 = vmatmul.msk.bf16.gmra.mxu1 %vm275_vm1, %v921_v52  ;;  %914 = vmatmul.msk.bf16.gmra.mxu3 %vm275_vm1, %v589_v18 }
  0x48   : > { %815 = vmatmul.msk.bf16.gmra.mxu0 %vm275_vm1, %v253_v21 }
  0x49   : > { %871 = vmatmul.msk.bf16.gmra.mxu2 %vm275_vm1, %v459_v22 }
  0x57   : > { %833 = vmatmul.msk.bf16.gmra.mxu1 %vm275_vm1, %v216_v8  ;;  %915 = vmatmul.msk.bf16.gmra.mxu3 %vm275_vm1, %v588_v13 }
  0x58   : > { %816 = vmatmul.msk.bf16.gmra.mxu0 %vm275_vm1, %v256_v25 }
  0x59   : > { %872 = vmatmul.msk.bf16.gmra.mxu2 %vm275_vm1, %v462_v26 }
  0x94   : > { %v361_v27 = vpop.f32.mrf.mxu1 }
  0x95   : > { %v300_v28 = vpop.f32.mrf.mxu0 }
  0x96   : > { %v362_v31 = vadd.f32 %v361_v27, %v300_v28 }
  0x9a   : > { %v632_v29 = vpop.f32.mrf.mxu3 }
  0x9c   : > { %v363_v30 = vpop.f32.mrf.mxu1  ;;  %v505_v32 = vpop.f32.mrf.mxu2 }
  0x9d   : > { %v302_v33 = vpop.f32.mrf.mxu0  ;;  %v529_v34 = vadd.f32 %v505_v32, %v362_v31 }
  0x9e   : > { %v364_v39 = vadd.f32 %v363_v30, %v302_v33 }
  0x9f   : > { %v656_v37 = vadd.f32 %v632_v29, %v529_v34 }
  0xa1   : > { %v669_v43 = vadd.f32 %v1108_v38, %v656_v37 }
  0xa2   : > { %v634_v35 = vpop.f32.mrf.mxu3 }
  0xa3   : > { %v678_v48 = vmax.f32 %v669_v43, 0.0 }
  0xa4   : > { %v366_v36 = vpop.f32.mrf.mxu1  ;;  %v507_v40 = vpop.f32.mrf.mxu2 }
  0xa5   : > { %v305_v41 = vpop.f32.mrf.mxu0  ;;  %v530_v42 = vadd.f32 %v507_v40, %v364_v39 }
  0xa6   : > { %v367_v50 = vadd.f32 %v366_v36, %v305_v41 }
  0xa7   : > { %v657_v44 = vadd.f32 %v634_v35, %v530_v42 }
  0xa9   : > { %v670_v46 = vadd.f32 %v1108_v38, %v657_v44 }
  0xaa   : > { %v637_v45 = vpop.f32.mrf.mxu3 }
  0xab   : > { %v679_v49 = vmax.f32 %v670_v46, 0.0 }
  0xac   : > { %v368_v47 = vpop.f32.mrf.mxu1  ;;  %v510_v51 = vpop.f32.mrf.mxu2 }
  0xad   : > { %v307_v52 = vpop.f32.mrf.mxu0  ;;  %v946_v53 = vpack.c.bf16 %v679_v49, %v678_v48  ;;  %v531_v54 = vadd.f32 %v510_v51, %v367_v50 }
  0xae   : > { %v369_v58 = vadd.f32 %v368_v47, %v307_v52 }
  0xaf   : > { %947 = vst [vmem:[%s1116_s22] sm:$0xff] %v946_v53   ;;  %v658_v57 = vadd.f32 %v637_v45, %v531_v54  ;;  %v707_v53 = vld [vmem:[%s1116_s22 + $0x20] sm:$0xf] }
  0xb1   : > { %v671_v62 = vadd.f32 %v1108_v38, %v658_v57 }
  0xb2   : > { %v639_v55 = vpop.f32.mrf.mxu3 }
  0xb3   : > { %v680_v3 = vmax.f32 %v671_v62, 0.0 }
  0xb4   : > { %v371_v56 = vpop.f32.mrf.mxu1  ;;  %v512_v59 = vpop.f32.mrf.mxu2 }
  0xb5   : > { %v310_v60 = vpop.f32.mrf.mxu0  ;;  %v532_v61 = vadd.f32 %v512_v59, %v369_v58 }
  0xb6   : > { %v372_v5 = vadd.f32 %v371_v56, %v310_v60 }
  0xb7   : > { %v659_v63 = vadd.f32 %v639_v55, %v532_v61 }
  0xb9   : > { %v672_v1 = vadd.f32 %v1108_v38, %v659_v63 }
  0xba   : > { %v642_v0 = vpop.f32.mrf.mxu3 }
  0xbb   : > { %v681_v4 = vmax.f32 %v672_v1, 0.0 }
  0xbc   : > { %v373_v2 = vpop.f32.mrf.mxu1  ;;  %v515_v6 = vpop.f32.mrf.mxu2 }
  0xbd   : > { %v312_v7 = vpop.f32.mrf.mxu0  ;;  %v951_v8 = vpack.c.bf16 %v681_v4, %v680_v3  ;;  %v533_v9 = vadd.f32 %v515_v6, %v372_v5 }
  0xbe   : > { %v374_v13 = vadd.f32 %v373_v2, %v312_v7 }
  0xbf   : > { %963 = vst [vmem:[%s1116_s22 + $0x8] sm:$0xff] %v951_v8   ;;  %v660_v12 = vadd.f32 %v642_v0, %v533_v9 }
  0xc1   : > { %v673_v17 = vadd.f32 %v1108_v38, %v660_v12 }
  0xc2   : > { %v644_v10 = vpop.f32.mrf.mxu3 }
  0xc3   : > { %v682_v22 = vmax.f32 %v673_v17, 0.0 }
  0xc4   : > { %v376_v11 = vpop.f32.mrf.mxu1  ;;  %v517_v14 = vpop.f32.mrf.mxu2 }
  0xc5   : > { %v315_v15 = vpop.f32.mrf.mxu0  ;;  %v534_v16 = vadd.f32 %v517_v14, %v374_v13 }
  0xc6   : > { %v377_v24 = vadd.f32 %v376_v11, %v315_v15 }
  0xc7   : > { %v661_v18 = vadd.f32 %v644_v10, %v534_v16 }
  0xc9   : > { %v674_v20 = vadd.f32 %v1108_v38, %v661_v18 }
  0xca   : > { %v647_v19 = vpop.f32.mrf.mxu3 }
  0xcb   : > { %v683_v23 = vmax.f32 %v674_v20, 0.0 }
  0xcc   : > { %v378_v21 = vpop.f32.mrf.mxu1  ;;  %v520_v25 = vpop.f32.mrf.mxu2 }
  0xcd   : > { %v317_v26 = vpop.f32.mrf.mxu0  ;;  %v956_v27 = vpack.c.bf16 %v683_v23, %v682_v22  ;;  %v535_v28 = vadd.f32 %v520_v25, %v377_v24 }
  0xce   : > { %v379_v32 = vadd.f32 %v378_v21, %v317_v26 }
  0xcf   : > { %964 = vst [vmem:[%s1116_s22 + $0x10] sm:$0xff] %v956_v27   ;;  %v662_v31 = vadd.f32 %v647_v19, %v535_v28 }
  0xd1   : > { %v675_v36 = vadd.f32 %v1108_v38, %v662_v31 }
  0xd2   : > { %v649_v29 = vpop.f32.mrf.mxu3 }
  0xd3   : > { %v684_v43 = vmax.f32 %v675_v36, 0.0 }
  0xd4   : > { %v381_v30 = vpop.f32.mrf.mxu1  ;;  %v522_v33 = vpop.f32.mrf.mxu2 }
  0xd5   : > { %v320_v34 = vpop.f32.mrf.mxu0  ;;  %v536_v35 = vadd.f32 %v522_v33, %v379_v32 }
  0xd6   : > { %v382_v41 = vadd.f32 %v381_v30, %v320_v34 }
  0xd7   : > { %v663_v37 = vadd.f32 %v649_v29, %v536_v35 }
  0xd9   : > { %v676_v40 = vadd.f32 %v1108_v38, %v663_v37 }
  0xda   : > { %v652_v39 = vpop.f32.mrf.mxu3 }
  0xdb   : > { %v685_v44 = vmax.f32 %v676_v40, 0.0 }
  0xdc   : > { %v383_v42 = vpop.f32.mrf.mxu1  ;;  %v525_v45 = vpop.f32.mrf.mxu2 }
  0xdd   : > { %v322_v46 = vpop.f32.mrf.mxu0  ;;  %v961_v47 = vpack.c.bf16 %v685_v44, %v684_v43  ;;  %v537_v48 = vadd.f32 %v525_v45, %v382_v41 }
  0xdf   : > { %965 = vst [vmem:[%s1116_s22 + $0x18] sm:$0xff] %v961_v47   ;;  %v664_v49 = vadd.f32 %v652_v39, %v537_v48 }
  0xe1   : > { %v677_v51 = vadd.f32 %v1108_v38, %v664_v49 }
  0xe2   : > { %v654_v50 = vpop.f32.mrf.mxu3 }
  0xe3   : > { %v686_v52 = vmax.f32 %v677_v51, 0.0 }
  0xe4   : > { %v527_v54 = vpop.f32.mrf.mxu2 }
  0xe5   : > { %v695_v55 = vpack.c.bf16 %v686_v52, %v686_v52 }
  0xe7   : > { %v708_v56 = vsel %vm706_vm5, %v695_v55, %v707_v53 }
  0xe8   : > { %709 = vst [vmem:[%s1116_s22 + $0x20] sm:$0xf] %v708_v56 }
  0xef   : > { %v713_v57 = vld [vmem:[%s1116_s22 + $0x20] sm:$0x8] }
  0xf0   : > { %v714_v58 = vsel %vm712_vm8, 0, %v713_v57 }
  0xf1   : > { %715 = vst [vmem:[%s1116_s22 + $0x20] sm:$0x8] %v714_v58 }
  0xf2 PF: > { %s13_s12 = sadd.s32 1, %s983_s12  }
  0xf3   : > { %p10_p4 = scmp.ge.s32.totalorder %s13_s12, 4  }
  0xf5   :  { %12 = sbr.rel (!%p10_p4) target bundleno = 1 (0x1), region = 65 }

// kernel: custom_policy_forward.5
= control target key start
LH: loop header
LB: loop body
LE: loop exit
PB: predicated region body
PF: predicated region fallthrough
CT: control target
= control target key end

     0   :  { %s871_s12 = smov 0   ;;  %s994_s0 = inlined_call_operand.vmem [shape: bf16[2,16,128], index: 0, kind: input, shape index: {}]   ;;  %s995_s1 = inlined_call_operand.vmem [shape: bf16[4,128,128], index: 1, kind: input, shape index: {}]   ;;  %s996_s2 = inlined_call_operand.vmem [shape: f32[1,128], index: 2, kind: input, shape index: {}]   ;;  %s997_s3 = inlined_call_operand.vmem [shape: bf16[2,12,128], index: 3, kind: output, shape index: {}]  }
   0x1 LB: > { %s603_s13 = sadd.s32 4294967295, %s849_s12   ;;  %p607_p0 = scmp.ge.s32.totalorder %s849_s12, 1  ;;  %s849_s12 = sphi %s871_s12, %s13_s12  }
   0x2   : > { %p137_p1 = scmp.lt.s32.totalorder %s849_s12, 3 }
   0x4   : > { %p138_p2 = pnand %p607_p0, %p137_p1 }
   0x5   : > { %p161_p3 = scmp.lt.s32.totalorder (!%p138_p2), %s603_s13, 1 }
   0x6   : > { %141 = sbr.rel (%p138_p2) target bundleno = 206 (0xce), region = 32 }
   0xb   : > { %v816_v0 = vld [vmem:[%s995_s1 + $0x78] sm:$0xff]  ;;  %v815_v4 = vld [vmem:[%s995_s1 + $0x70] sm:$0xff]  ;;  %s999_s13 = smov (!%p161_p3, %s603_s13), 1  ;;  %v814_v8 = vld [vmem:[%s995_s1 + $0x68] sm:$0xff]  ;;  %vm536_vm0 = vcmask 1041408   ;;  %vm542_vm3 = vcmask 1041409  }
   0xc   : > { %v808_v1 = vld [vmem:[%s995_s1 + $0x38] sm:$0xff]  ;;  %268 = vmatpush.bf16.msra.mxu0 %v816_v0  ;;  %v807_v5 = vld [vmem:[%s995_s1 + $0x30] sm:$0xff]  ;;  %v806_v9 = vld [vmem:[%s995_s1 + $0x28] sm:$0xff]  ;;  %s798_s11 = sshll.u32 %s999_s13, 3  ;;  %vm537_vm1 = vsmask.f32 1280 }
   0xd   : > { %v825_v2 = vld [vmem:[%s995_s1 + $0xb8] sm:$0xff]  ;;  %331 = vmatpush.bf16.msra.mxu1 %v808_v1  ;;  %v824_v6 = vld [vmem:[%s995_s1 + $0xb0] sm:$0xff]  ;;  %v823_v10 = vld [vmem:[%s995_s1 + $0xa8] sm:$0xff]  ;;  %s165_s24 = scalar_lea.vmem %s994_s0, %s798_s11  ;;  %s170_s10 = scalar_lea.vmem %s997_s3, %s798_s11  ;;  %vm543_vm4 = vsmask.f32 7942 }
   0xe   : > { %v833_v3 = vld [vmem:[%s995_s1 + $0xf8] sm:$0xff]  ;;  %419 = vmatpush.bf16.msra.mxu2 %v825_v2  ;;  %v832_v7 = vld [vmem:[%s995_s1 + $0xf0] sm:$0xff]  ;;  %v831_v11 = vld [vmem:[%s995_s1 + $0xe8] sm:$0xff] }
   0xf   : > { %509 = vmatpush.bf16.msra.mxu3 %v833_v3  ;;  %v813_v12 = vld [vmem:[%s995_s1 + $0x60] sm:$0xff]  ;;  %v812_v16 = vld [vmem:[%s995_s1 + $0x58] sm:$0xff]  ;;  %v811_v25 = vld [vmem:[%s995_s1 + $0x50] sm:$0xff] }
  0x10   : > { %269 = vmatpush.bf16.msra.mxu0 %v815_v4  ;;  %v805_v13 = vld [vmem:[%s995_s1 + $0x20] sm:$0xff]  ;;  %v804_v17 = vld [vmem:[%s995_s1 + $0x18] sm:$0xff]  ;;  %v803_v26 = vld [vmem:[%s995_s1 + $0x10] sm:$0xff] }
  0x11   : > { %332 = vmatpush.bf16.msra.mxu1 %v807_v5  ;;  %v822_v14 = vld [vmem:[%s995_s1 + $0xa0] sm:$0xff]  ;;  %v821_v18 = vld [vmem:[%s995_s1 + $0x98] sm:$0xff]  ;;  %v820_v28 = vld [vmem:[%s995_s1 + $0x90] sm:$0xff] }
  0x12   : > { %420 = vmatpush.bf16.msra.mxu2 %v824_v6  ;;  %v830_v15 = vld [vmem:[%s995_s1 + $0xe0] sm:$0xff]  ;;  %v829_v21 = vld [vmem:[%s995_s1 + $0xd8] sm:$0xff]  ;;  %v828_v29 = vld [vmem:[%s995_s1 + $0xd0] sm:$0xff] }
  0x13   : > { %510 = vmatpush.bf16.msra.mxu3 %v832_v7  ;;  %v630_v19 = vld [vmem:[%s165_s24] sm:$0xf]  ;;  %v800_v20 = vld [vmem:[%s165_s24] sm:$0x30]  ;;  %v810_v31 = vld [vmem:[%s995_s1 + $0x48] sm:$0xff] }
  0x14   : > { %270 = vmatpush.bf16.msra.mxu0 %v814_v8  ;;  %v714_v22 = vld [vmem:[%s165_s24] sm:$0xc]  ;;  %v817_v23 = vld [vmem:[%s165_s24] sm:$0xf0]  ;;  %v631_v24 = vor.u32 %v800_v20, %v630_v19  ;;  %v802_v32 = vld [vmem:[%s995_s1 + $0x8] sm:$0xff] }
  0x15   : > { %333 = vmatpush.bf16.msra.mxu1 %v806_v9  ;;  %v715_v27 = vor.u32 %v817_v23, %v714_v22  ;;  %v819_v35 = vld [vmem:[%s995_s1 + $0x88] sm:$0xff]  ;;  %v809_v39 = vld [vmem:[%s995_s1 + $0x40] sm:$0xff]  ;;  %vm538_vm2 = vmand %vm536_vm0, %vm537_vm1 }
  0x16   : > { %421 = vmatpush.bf16.msra.mxu2 %v823_v10  ;;  %v215_v30 = vshll.u32 %v631_v24, 16  ;;  %v827_v36 = vld [vmem:[%s995_s1 + $0xc8] sm:$0xff]  ;;  %v213_v37 = vshrl.u32 %v631_v24, 16  ;;  %v801_v40 = vld [vmem:[%s995_s1] sm:$0xff]  ;;  %vm544_vm5 = vmand %vm542_vm3, %vm543_vm4 }
  0x17   : > { %511 = vmatpush.bf16.msra.mxu3 %v831_v11  ;;  %v453_v33 = vshrl.u32 %v715_v27, 16  ;;  %v456_v34 = vshll.u32 %v715_v27, 16  ;;  %v818_v43 = vld [vmem:[%s995_s1 + $0x80] sm:$0xff]  ;;  %v369_v46 = vrot.slane %v715_v27, 2 }
  0x18   : > { %271 = vmatpush.bf16.msra.mxu0 %v813_v12  ;;  %v217_v38 = vrot.slane %v215_v30, 1  ;;  %v826_v44 = vld [vmem:[%s995_s1 + $0xc0] sm:$0xff] }
  0x19   : > { %334 = vmatpush.bf16.msra.mxu1 %v805_v13  ;;  %v455_v41 = vrot.slane %v453_v33, 2  ;;  %v458_v42 = vrot.slane %v456_v34, 3  ;;  %v842_v54 = vld [vmem:[%s996_s2] ss:$0 sm:$0xff]  ;;  %v539_v4 = vld [vmem:[%s170_s10 + $0x4] sm:$0x3] }
  0x1a   : > { %422 = vmatpush.bf16.msra.mxu2 %v822_v14  ;;  %v218_v45 = vor.u32 %v217_v38, %v213_v37 }
  0x1b   : > { %512 = vmatpush.bf16.msra.mxu3 %v830_v15  ;;  %v459_v47 = vor.u32 %v458_v42, %v455_v41 }
  0x1c   : > { %272 = vmatpush.bf16.msra.mxu0 %v812_v16 }
  0x1d   : > { %335 = vmatpush.bf16.msra.mxu1 %v804_v17 }
  0x1e   : > { %423 = vmatpush.bf16.msra.mxu2 %v821_v18 }
  0x1f   : > { %513 = vmatpush.bf16.msra.mxu3 %v829_v21 }
  0x20   : > { %273 = vmatpush.bf16.msra.mxu0 %v811_v25 }
  0x21   : > { %336 = vmatpush.bf16.msra.mxu1 %v803_v26 }
  0x22   : > { %424 = vmatpush.bf16.msra.mxu2 %v820_v28 }
  0x23   : > { %514 = vmatpush.bf16.msra.mxu3 %v828_v29 }
  0x24   : > { %274 = vmatpush.bf16.msra.mxu0 %v810_v31 }
  0x25   : > { %337 = vmatpush.bf16.msra.mxu1 %v802_v32 }
  0x26   : > { %425 = vmatpush.bf16.msra.mxu2 %v819_v35 }
  0x27   : > { %515 = vmatpush.bf16.msra.mxu3 %v827_v36 }
  0x28   : > { %275 = vmatpush.bf16.msra.mxu0 %v809_v39 }
  0x29   : > { %338 = vmatpush.bf16.msra.mxu1 %v801_v40 }
  0x2a   : > { %426 = vmatpush.bf16.msra.mxu2 %v818_v43 }
  0x2b   : > { %516 = vmatpush.bf16.msra.mxu3 %v826_v44  ;;  %276 = vmatmul.bf16.vlgmr.msra.gmra.mxu0 %v218_v45 }
  0x2c   : > { %339 = vmatmul.bf16.vlgmr.msra.gmra.mxu1 %v631_v24 }
  0x2d   : > { %427 = vmatmul.bf16.vlgmr.msra.gmra.mxu2 %v369_v46 }
  0x2e   : > { %517 = vmatmul.bf16.vlgmr.msra.gmra.mxu3 %v459_v47 }
  0xa8   : > { %v277_v48 = vpop.f32.mrf.mxu0 }
  0xa9   : > { %v340_v49 = vpop.f32.mrf.mxu1 }
  0xaa   : > { %v341_v50 = vadd.f32 %v340_v49, %v277_v48 }
  0xb0   : > { %v428_v51 = vpop.f32.mrf.mxu2  ;;  %v279_v56 = vpop.f32.mrf.mxu0 }
  0xb1   : > { %v518_v52 = vpop.f32.mrf.mxu3  ;;  %v433_v53 = vadd.f32 %v428_v51, %v341_v50  ;;  %v342_v57 = vpop.f32.mrf.mxu1 }
  0xb2   : > { %v343_v60 = vadd.f32 %v342_v57, %v279_v56 }
  0xb3   : > { %v523_v55 = vadd.f32 %v518_v52, %v433_v53 }
  0xb5   : > { %v529_v58 = vadd.f32 %v842_v54, %v523_v55 }
  0xb7   : > { %v531_v59 = vmax.f32 %v529_v58, 0.0 }
  0xb8   : > { %v430_v61 = vpop.f32.mrf.mxu2 }
  0xb9   : > { %v533_v62 = vpack.c.bf16 %v531_v59, %v531_v59  ;;  %v434_v63 = vadd.f32 %v430_v61, %v343_v60  ;;  %v520_v0 = vpop.f32.mrf.mxu3 }
  0xbb   : > { %535 = vst [vmem:[%s170_s10] sm:$0xf] %v533_v62  ;;  %v524_v1 = vadd.f32 %v520_v0, %v434_v63 }
  0xbd   : > { %v530_v2 = vadd.f32 %v842_v54, %v524_v1 }
  0xbf   : > { %v532_v3 = vmax.f32 %v530_v2, 0.0 }
  0xc1   : > { %v534_v5 = vpack.c.bf16 %v532_v3, %v532_v3 }
  0xc3   : > { %v540_v6 = vsel %vm538_vm2, %v534_v5, %v539_v4 }
  0xc4   : > { %541 = vst [vmem:[%s170_s10 + $0x4] sm:$0x3] %v540_v6 }
  0xcb   : > { %v545_v7 = vld [vmem:[%s170_s10 + $0x4] sm:$0x2] }
  0xcc   : > { %v546_v8 = vsel %vm544_vm5, 0, %v545_v7 }
  0xcd   : > { %547 = vst [vmem:[%s170_s10 + $0x4] sm:$0x2] %v546_v8 }
  0xce PF: > { %s13_s12 = sadd.s32 1, %s849_s12  }
  0xcf   : > { %p10_p4 = scmp.ge.s32.totalorder %s13_s12, 4  }
  0xd1   :  { %12 = sbr.rel (!%p10_p4) target bundleno = 1 (0x1), region = 65 }

// kernel: custom_policy_forward.6
= control target key start
LH: loop header
LB: loop body
LE: loop exit
PB: predicated region body
PF: predicated region fallthrough
CT: control target
= control target key end

     0   :  { %s1022_s12 = smov 0   ;;  %s1170_s0 = inlined_call_operand.vmem [shape: bf16[2,9,64], index: 0, kind: input, shape index: {}]   ;;  %s1171_s1 = inlined_call_operand.vmem [shape: bf16[9,64,128], index: 1, kind: input, shape index: {}]   ;;  %s1172_s2 = inlined_call_operand.vmem [shape: f32[1,128], index: 2, kind: input, shape index: {}]   ;;  %s1173_s3 = inlined_call_operand.vmem [shape: bf16[2,3,128], index: 3, kind: output, shape index: {}]  }
   0x1 LB: > { %s722_s13 = sadd.s32 4294967295, %s1000_s12   ;;  %p726_p0 = scmp.ge.s32.totalorder %s1000_s12, 1  ;;  %s1000_s12 = sphi %s1022_s12, %s13_s12  }
   0x2   : > { %p137_p1 = scmp.lt.s32.totalorder %s1000_s12, 3 }
   0x4   : > { %p138_p2 = pnand %p726_p0, %p137_p1 }
   0x5   : > { %p160_p3 = scmp.lt.s32.totalorder (!%p138_p2), %s722_s13, 1 }
   0x6   : > { %141 = sbr.rel (%p138_p2) target bundleno = 204 (0xcc), region = 32 }
   0xb   : > { %v957_v0 = vld [vmem:[%s1171_s1 + $0x38] sm:$0xff]  ;;  %v956_v4 = vld [vmem:[%s1171_s1 + $0x30] sm:$0xff]  ;;  %s1175_s13 = smov (!%p160_p3, %s722_s13), 1  ;;  %v955_v8 = vld [vmem:[%s1171_s1 + $0x28] sm:$0xff]  ;;  %vm218_vm0 = vcmask 523264   ;;  %vm657_vm1 = vcmask 1040384  }
   0xc   : > { %v953_v1 = vld [vmem:[%s1171_s1 + $0x18] sm:$0xff]  ;;  %226 = vmatpush.bf16.msra.mxu0 %v957_v0  ;;  %v952_v5 = vld [vmem:[%s1171_s1 + $0x10] sm:$0xff]  ;;  %s949_s30 = sshll.u32 %s1175_s13, 3  ;;  %v951_v9 = vld [vmem:[%s1171_s1 + $0x8] sm:$0xff]  ;;  %vm658_vm2 = vsmask.f32 256 }
   0xd   : > { %v961_v2 = vld [vmem:[%s1171_s1 + $0x58] sm:$0xff]  ;;  %266 = vmatpush.bf16.msra.mxu1 %v953_v1  ;;  %v960_v6 = vld [vmem:[%s1171_s1 + $0x50] sm:$0xff]  ;;  %s1063_s8 = scalar_lea.vmem %s1170_s0, %s949_s30  ;;  %v959_v12 = vld [vmem:[%s1171_s1 + $0x48] sm:$0xff]  ;;  %vm663_vm4 = vcmask 1041408   ;;  %vm664_vm5 = vsmask.f32 1282 }
   0xe   : > { %v965_v3 = vld [vmem:[%s1171_s1 + $0x78] sm:$0xff]  ;;  %320 = vmatpush.bf16.msra.mxu2 %v961_v2  ;;  %v964_v7 = vld [vmem:[%s1171_s1 + $0x70] sm:$0xff]  ;;  %v170_v10 = vld [vmem:[%s1063_s8] sm:$0x1] }
   0xf   : > { %374 = vmatpush.bf16.msra.mxu3 %v965_v3  ;;  %v275_v11 = vld [vmem:[%s1063_s8] sm:$0x2]  ;;  %v963_v13 = vld [vmem:[%s1171_s1 + $0x68] sm:$0xff]  ;;  %v189_v14 = vunpack.c.l.b16 %v170_v10  ;;  %v969_v23 = vld [vmem:[%s1171_s1 + $0x98] sm:$0xff] }
  0x10   : > { %227 = vmatpush.bf16.msra.mxu0 %v956_v4  ;;  %v286_v15 = vunpack.c.l.b16 %v275_v11  ;;  %v954_v18 = vld [vmem:[%s1171_s1 + $0x20] sm:$0xff]  ;;  %v977_v24 = vld [vmem:[%s1171_s1 + $0xd8] sm:$0xff]  ;;  %v968_v31 = vld [vmem:[%s1171_s1 + $0x90] sm:$0xff] }
  0x11   : > { %267 = vmatpush.bf16.msra.mxu1 %v952_v5  ;;  %v190_v16 = vpack.c.b16 %v189_v14, %v189_v14  ;;  %v950_v19 = vld [vmem:[%s1171_s1] sm:$0xff]  ;;  %v981_v28 = vld [vmem:[%s1171_s1 + $0xf8] sm:$0xff]  ;;  %v976_v32 = vld [vmem:[%s1171_s1 + $0xd0] sm:$0xff] }
  0x12   : > { %321 = vmatpush.bf16.msra.mxu2 %v960_v6  ;;  %v287_v17 = vpack.c.b16 %v286_v15, %v286_v15  ;;  %v958_v20 = vld [vmem:[%s1171_s1 + $0x40] sm:$0xff]  ;;  %v973_v29 = vld [vmem:[%s1171_s1 + $0xb8] sm:$0xff]  ;;  %v980_v35 = vld [vmem:[%s1171_s1 + $0xf0] sm:$0xff] }
  0x13   : > { %375 = vmatpush.bf16.msra.mxu3 %v964_v7  ;;  %v962_v21 = vld [vmem:[%s1171_s1 + $0x60] sm:$0xff]  ;;  %v192_v25 = vshrl.u32 %v190_v16, 16  ;;  %v972_v36 = vld [vmem:[%s1171_s1 + $0xb0] sm:$0xff]  ;;  %v967_v38 = vld [vmem:[%s1171_s1 + $0x88] sm:$0xff] }
  0x14   : > { %228 = vmatpush.bf16.msra.mxu0 %v955_v8  ;;  %v340_v22 = vshrl.u32 %v287_v17, 16  ;;  %v288_v26 = vrot.slane %v287_v17, 1  ;;  %v493_v30 = vld [vmem:[%s1063_s8] sm:$0x8]  ;;  %v384_v33 = vld [vmem:[%s1063_s8] sm:$0x4]  ;;  %vm659_vm3 = vmand %vm657_vm1, %vm658_vm2 }
  0x15   : > { %268 = vmatpush.bf16.msra.mxu1 %v951_v9  ;;  %v504_v34 = vunpack.c.l.b16 %v493_v30  ;;  %v395_v37 = vunpack.c.l.b16 %v384_v33  ;;  %v975_v39 = vld [vmem:[%s1171_s1 + $0xc8] sm:$0xff]  ;;  %v966_v44 = vld [vmem:[%s1171_s1 + $0x80] sm:$0xff]  ;;  %v985_v46 = vld [vmem:[%s1171_s1 + $0x118] sm:$0xff] }
  0x16   : > { %322 = vmatpush.bf16.msra.mxu2 %v959_v12  ;;  %v342_v27 = vrot.slane %v340_v22, 1  ;;  %v979_v41 = vld [vmem:[%s1171_s1 + $0xe8] sm:$0xff]  ;;  %v974_v45 = vld [vmem:[%s1171_s1 + $0xc0] sm:$0xff]  ;;  %v984_v55 = vld [vmem:[%s1171_s1 + $0x110] sm:$0xff] }
  0x17   : > { %376 = vmatpush.bf16.msra.mxu3 %v963_v13  ;;  %v505_v40 = vpack.c.b16 %v504_v34, %v504_v34  ;;  %v971_v42 = vld [vmem:[%s1171_s1 + $0xa8] sm:$0xff]  ;;  %v396_v43 = vpack.c.b16 %v395_v37, %v395_v37  ;;  %v978_v48 = vld [vmem:[%s1171_s1 + $0xe0] sm:$0xff]  ;;  %vm665_vm6 = vmand %vm663_vm4, %vm664_vm5 }
  0x18   : > { %229 = vmatpush.bf16.msra.mxu0 %v954_v18  ;;  %v970_v49 = vld [vmem:[%s1171_s1 + $0xa0] sm:$0xff]  ;;  %v983_v56 = vld [vmem:[%s1171_s1 + $0x108] sm:$0xff] }
  0x19   : > { %269 = vmatpush.bf16.msra.mxu1 %v950_v19  ;;  %v558_v47 = vshrl.u32 %v505_v40, 16  ;;  %v449_v50 = vshrl.u32 %v396_v43, 16  ;;  %v397_v51 = vrot.slane %v396_v43, 2  ;;  %v506_v52 = vrot.slane %v505_v40, 3  ;;  %v982_v57 = vld [vmem:[%s1171_s1 + $0x100] sm:$0xff] }
  0x1a   : > { %323 = vmatpush.bf16.msra.mxu2 %v958_v20  ;;  %v602_v58 = vld [vmem:[%s1063_s8 + $0x4] sm:$0x1]  ;;  %s729_s8 = sshll.u32 %s1175_s13, 1  ;;  %v653_v19 = vld [vmem:[%s1172_s2] sm:$0x1] }
  0x1b   : > { %377 = vmatpush.bf16.msra.mxu3 %v962_v21  ;;  %754 = vmatmul.msk.bf16.vlgmr.msra.gmra.mxu0 %vm218_vm0, %v192_v25  ;;  %v560_v53 = vrot.slane %v558_v47, 3  ;;  %v451_v54 = vrot.slane %v449_v50, 2  ;;  %s168_s21 = scalar_lea.vmem %s1173_s3, %s729_s8 }
  0x1c   : > { %429 = vmatpush.bf16.msrb.mxu0 %v969_v23  ;;  %771 = vmatmul.msk.bf16.vlgmr.msra.gmra.mxu1 %vm218_vm0, %v170_v10  ;;  %v660_v23 = vld [vmem:[%s168_s21] sm:$0x1] }
  0x1d   : > { %796 = vmatmul.msk.bf16.vlgmr.msra.gmra.mxu2 %vm218_vm0, %v288_v26  ;;  %483 = vmatpush.bf16.msrb.mxu1 %v973_v29 }
  0x1e   : > { %538 = vmatpush.bf16.msrb.mxu2 %v977_v24  ;;  %821 = vmatmul.msk.bf16.vlgmr.msra.gmra.mxu3 %vm218_vm0, %v342_v27 }
  0x1f   : > { %592 = vmatpush.bf16.msrb.mxu3 %v981_v28 }
  0x20   : > { %430 = vmatpush.bf16.msrb.mxu0 %v968_v31 }
  0x21   : > { %484 = vmatpush.bf16.msrb.mxu1 %v972_v36 }
  0x22   : > { %539 = vmatpush.bf16.msrb.mxu2 %v976_v32 }
  0x23   : > { %593 = vmatpush.bf16.msrb.mxu3 %v980_v35 }
  0x24   : > { %431 = vmatpush.bf16.msrb.mxu0 %v967_v38 }
  0x25   : > { %485 = vmatpush.bf16.msrb.mxu1 %v971_v42 }
  0x26   : > { %540 = vmatpush.bf16.msrb.mxu2 %v975_v39 }
  0x27   : > { %594 = vmatpush.bf16.msrb.mxu3 %v979_v41 }
  0x28   : > { %432 = vmatpush.bf16.msrb.mxu0 %v966_v44 }
  0x29   : > { %486 = vmatpush.bf16.msrb.mxu1 %v970_v49 }
  0x2a   : > { %541 = vmatpush.bf16.msrb.mxu2 %v974_v45 }
  0x2b   : > { %595 = vmatpush.bf16.msrb.mxu3 %v978_v48  ;;  %846 = vmatmul.msk.bf16.vlgmr.msrb.gmra.mxu0 %vm218_vm0, %v397_v51 }
  0x2c   : > { %643 = vmatpush.bf16.msra.mxu0 %v985_v46  ;;  %871 = vmatmul.msk.bf16.vlgmr.msrb.gmra.mxu1 %vm218_vm0, %v451_v54 }
  0x2d   : > { %896 = vmatmul.msk.bf16.vlgmr.msrb.gmra.mxu2 %vm218_vm0, %v506_v52 }
  0x2e   : > { %921 = vmatmul.msk.bf16.vlgmr.msrb.gmra.mxu3 %vm218_vm0, %v560_v53 }
  0x30   : > { %644 = vmatpush.bf16.msra.mxu0 %v984_v55 }
  0x34   : > { %645 = vmatpush.bf16.msra.mxu0 %v983_v56 }
  0x38   : > { %646 = vmatpush.bf16.msra.mxu0 %v982_v57 }
  0x3b   : > { %946 = vmatmul.msk.bf16.vlgmr.msra.gmra.mxu0 %vm218_vm0, %v602_v58 }
  0x98   : > { %v231_v59 = vpop.f32.mrf.mxu0 }
  0x99   : > { %v271_v60 = vpop.f32.mrf.mxu1 }
  0x9a   : > { %v272_v1 = vadd.f32 %v271_v60, %v231_v59 }
  0xa0   : > { %v325_v61 = vpop.f32.mrf.mxu2  ;;  %v233_v63 = vpop.f32.mrf.mxu0 }
  0xa1   : > { %v379_v62 = vpop.f32.mrf.mxu3  ;;  %v273_v0 = vpop.f32.mrf.mxu1  ;;  %v329_v2 = vadd.f32 %v325_v61, %v272_v1 }
  0xa3   : > { %v383_v7 = vadd.f32 %v379_v62, %v329_v2 }
  0xa8   : > { %v327_v3 = vpop.f32.mrf.mxu2  ;;  %v434_v5 = vpop.f32.mrf.mxu0 }
  0xa9   : > { %v381_v4 = vpop.f32.mrf.mxu3  ;;  %v488_v6 = vpop.f32.mrf.mxu1  ;;  %v438_v8 = vadd.f32 %v434_v5, %v383_v7 }
  0xab   : > { %v492_v12 = vadd.f32 %v488_v6, %v438_v8 }
  0xb0   : > { %v543_v9 = vpop.f32.mrf.mxu2  ;;  %v436_v11 = vpop.f32.mrf.mxu0 }
  0xb1   : > { %v597_v10 = vpop.f32.mrf.mxu3  ;;  %v490_v13 = vpop.f32.mrf.mxu1  ;;  %v547_v14 = vadd.f32 %v543_v9, %v492_v12 }
  0xb3   : > { %v601_v15 = vadd.f32 %v597_v10, %v547_v14 }
  0xb8   : > { %v545_v16 = vpop.f32.mrf.mxu2  ;;  %v648_v18 = vpop.f32.mrf.mxu0 }
  0xb9   : > { %v599_v17 = vpop.f32.mrf.mxu3  ;;  %v652_v20 = vadd.f32 %v648_v18, %v601_v15 }
  0xbb   : > { %v654_v21 = vadd.f32 %v653_v19, %v652_v20 }
  0xbd   : > { %v655_v22 = vmax.f32 %v654_v21, 0.0 }
  0xbf   : > { %v656_v24 = vpack.c.bf16 %v655_v22, %v655_v22 }
  0xc0   : > { %v650_v25 = vpop.f32.mrf.mxu0 }
  0xc1   : > { %v661_v26 = vsel %vm659_vm3, %v656_v24, %v660_v23 }
  0xc2   : > { %662 = vst [vmem:[%s168_s21] sm:$0x1] %v661_v26 }
  0xc9   : > { %v666_v27 = vld [vmem:[%s168_s21] sm:$0x3] }
  0xca   : > { %v667_v28 = vsel %vm665_vm6, 0, %v666_v27 }
  0xcb   : > { %668 = vst [vmem:[%s168_s21] sm:$0x3] %v667_v28 }
  0xcc PF: > { %s13_s12 = sadd.s32 1, %s1000_s12  }
  0xcd   : > { %p10_p4 = scmp.ge.s32.totalorder %s13_s12, 4  }
  0xcf   :  { %12 = sbr.rel (!%p10_p4) target bundleno = 1 (0x1), region = 70 }

// kernel: custom_policy_forward.7
= control target key start
LH: loop header
LB: loop body
LE: loop exit
PB: predicated region body
PF: predicated region fallthrough
CT: control target
= control target key end

     0   :  { %vm58_vm0 = vcmask 523264   ;;  %s1046_s1 = inlined_call_operand.vmem [shape: bf16[64,512], index: 1, kind: input, shape index: {}]   ;;  %s1047_s2 = inlined_call_operand.vmem [shape: f32[1,512], index: 2, kind: input, shape index: {}]   ;;  %s1048_s0 = inlined_call_operand.vmem [shape: bf16[2,64], index: 0, kind: input, shape index: {}]   ;;  %s1049_s3 = inlined_call_operand.vmem [shape: bf16[512,128], index: 3, kind: input, shape index: {}]   ;;  %s1050_s4 = inlined_call_operand.vmem [shape: f32[1,128], index: 4, kind: input, shape index: {}]   ;;  %s1051_s5 = inlined_call_operand.vmem [shape: f32[2,128], index: 5, kind: output, shape index: {}]  }
   0x1   :  { %v564_v0 = vld [vmem:[%s1046_s1 + $0x60] sm:$0xf]  ;;  %v749_v1 = vld [vmem:[%s1046_s1 + $0x6c] sm:$0xf0]  ;;  %v581_v2 = vld [vmem:[%s1046_s1 + $0x64] sm:$0xf] }
   0x2   :  { %v565_v3 = vor.u32 %v749_v1, %v564_v0  ;;  %v761_v4 = vld [vmem:[%s1046_s1 + $0x70] sm:$0xf0]  ;;  %v560_v5 = vld [vmem:[%s1046_s1 + $0x40] sm:$0xf]  ;;  %v748_v6 = vld [vmem:[%s1046_s1 + $0x4c] sm:$0xf0] }
   0x3   :  { %v582_v7 = vor.u32 %v761_v4, %v581_v2  ;;  %v577_v8 = vld [vmem:[%s1046_s1 + $0x44] sm:$0xf]  ;;  %v760_v9 = vld [vmem:[%s1046_s1 + $0x50] sm:$0xf0]  ;;  %v561_v10 = vor.u32 %v748_v6, %v560_v5  ;;  %v556_v12 = vld [vmem:[%s1046_s1 + $0x20] sm:$0xf] }
   0x4   :  { %66 = vmatpush.bf16.msra.mxu0 %v565_v3  ;;  %v578_v11 = vor.u32 %v760_v9, %v577_v8  ;;  %v747_v13 = vld [vmem:[%s1046_s1 + $0x2c] sm:$0xf0]  ;;  %v573_v14 = vld [vmem:[%s1046_s1 + $0x24] sm:$0xf]  ;;  %v759_v15 = vld [vmem:[%s1046_s1 + $0x30] sm:$0xf0] }
   0x5   :  { %133 = vmatpush.bf16.msra.mxu1 %v582_v7  ;;  %v557_v16 = vor.u32 %v747_v13, %v556_v12  ;;  %v574_v17 = vor.u32 %v759_v15, %v573_v14  ;;  %v552_v18 = vld [vmem:[%s1046_s1] sm:$0xf]  ;;  %v746_v19 = vld [vmem:[%s1046_s1 + $0xc] sm:$0xf0]  ;;  %v569_v20 = vld [vmem:[%s1046_s1 + $0x4] sm:$0xf] }
   0x6   :  { %v758_v21 = vld [vmem:[%s1046_s1 + $0x10] sm:$0xf0]  ;;  %v662_v22 = vld [vmem:[%s1046_s1 + $0x68] sm:$0xf]  ;;  %v773_v23 = vld [vmem:[%s1046_s1 + $0x74] sm:$0xf0]  ;;  %v553_v24 = vor.u32 %v746_v19, %v552_v18 }
   0x7   :  { %v570_v25 = vor.u32 %v758_v21, %v569_v20  ;;  %v663_v26 = vor.u32 %v773_v23, %v662_v22  ;;  %v658_v27 = vld [vmem:[%s1046_s1 + $0x48] sm:$0xf]  ;;  %v772_v28 = vld [vmem:[%s1046_s1 + $0x54] sm:$0xf0]  ;;  %v21_v29 = vld [vmem:[%s1048_s0] sm:$0x1] }
   0x8   :  { %67 = vmatpush.bf16.msra.mxu0 %v561_v10  ;;  %v659_v30 = vor.u32 %v772_v28, %v658_v27  ;;  %v654_v31 = vld [vmem:[%s1046_s1 + $0x28] sm:$0xf]  ;;  %v771_v32 = vld [vmem:[%s1046_s1 + $0x34] sm:$0xf0]  ;;  %v768_v37 = vld [vmem:[%s1049_s3 + $0x70] sm:$0xff] }
   0x9   :  { %134 = vmatpush.bf16.msra.mxu1 %v578_v11  ;;  %v769_v33 = vld [vmem:[%s1049_s3 + $0x78] sm:$0xff]  ;;  %v655_v35 = vor.u32 %v771_v32, %v654_v31  ;;  %v650_v36 = vld [vmem:[%s1046_s1 + $0x8] sm:$0xf]  ;;  %v756_v39 = vld [vmem:[%s1049_s3 + $0x30] sm:$0xff] }
   0xa   :  { %v757_v34 = vld [vmem:[%s1049_s3 + $0x38] sm:$0xff]  ;;  %208 = vmatpush.bf16.msra.mxu2 %v769_v33  ;;  %v711_v41 = vld [vmem:[%s1046_s1 + $0x6c] sm:$0xf]  ;;  %v780_v43 = vld [vmem:[%s1049_s3 + $0xb0] sm:$0xff] }
   0xb   :  { %v770_v38 = vld [vmem:[%s1046_s1 + $0x14] sm:$0xf0]  ;;  %269 = vmatpush.bf16.msra.mxu3 %v757_v34  ;;  %v785_v42 = vld [vmem:[%s1046_s1 + $0x78] sm:$0xf0]  ;;  %v767_v45 = vld [vmem:[%s1049_s3 + $0x68] sm:$0xff] }
   0xc   :  { %68 = vmatpush.bf16.msra.mxu0 %v557_v16  ;;  %v781_v40 = vld [vmem:[%s1049_s3 + $0xb8] sm:$0xff]  ;;  %v651_v44 = vor.u32 %v770_v38, %v650_v36  ;;  %v712_v46 = vor.u32 %v785_v42, %v711_v41  ;;  %v755_v47 = vld [vmem:[%s1049_s3 + $0x28] sm:$0xff]  ;;  %v766_v50 = vld [vmem:[%s1049_s3 + $0x60] sm:$0xff] }
   0xd   :  { %135 = vmatpush.bf16.msra.mxu1 %v574_v17  ;;  %v707_v48 = vld [vmem:[%s1046_s1 + $0x4c] sm:$0xf]  ;;  %v784_v49 = vld [vmem:[%s1046_s1 + $0x58] sm:$0xf0]  ;;  %v754_v52 = vld [vmem:[%s1049_s3 + $0x20] sm:$0xff] }
   0xe   :  { %209 = vmatpush.bf16.msra.mxu2 %v768_v37  ;;  %v708_v51 = vor.u32 %v784_v49, %v707_v48  ;;  %v703_v53 = vld [vmem:[%s1046_s1 + $0x2c] sm:$0xf]  ;;  %v783_v54 = vld [vmem:[%s1046_s1 + $0x38] sm:$0xf0]  ;;  %v764_v60 = vld [vmem:[%s1049_s3 + $0x50] sm:$0xff] }
   0xf   :  { %270 = vmatpush.bf16.msra.mxu3 %v756_v39  ;;  %v765_v55 = vld [vmem:[%s1049_s3 + $0x58] sm:$0xff]  ;;  %v704_v56 = vor.u32 %v783_v54, %v703_v53  ;;  %v699_v58 = vld [vmem:[%s1046_s1 + $0xc] sm:$0xf]  ;;  %v752_v62 = vld [vmem:[%s1049_s3 + $0x10] sm:$0xff] }
  0x10   :  { %69 = vmatpush.bf16.msra.mxu0 %v553_v24  ;;  %v753_v57 = vld [vmem:[%s1049_s3 + $0x18] sm:$0xff]  ;;  %v763_v63 = vld [vmem:[%s1049_s3 + $0x48] sm:$0xff]  ;;  %v762_v2 = vld [vmem:[%s1049_s3 + $0x40] sm:$0xff] }
  0x11   :  { %136 = vmatpush.bf16.msra.mxu1 %v570_v25  ;;  %v782_v59 = vld [vmem:[%s1046_s1 + $0x18] sm:$0xf0]  ;;  %v751_v0 = vld [vmem:[%s1049_s3 + $0x8] sm:$0xff]  ;;  %v750_v3 = vld [vmem:[%s1049_s3] sm:$0xff] }
  0x12   :  { %210 = vmatpush.bf16.msra.mxu2 %v767_v45  ;;  %v700_v61 = vor.u32 %v782_v59, %v699_v58  ;;  %v779_v1 = vld [vmem:[%s1049_s3 + $0xa8] sm:$0xff]  ;;  %v778_v4 = vld [vmem:[%s1049_s3 + $0xa0] sm:$0xff]  ;;  %v777_v5 = vld [vmem:[%s1049_s3 + $0x98] sm:$0xff] }
  0x13   :  { %566 = vmatmul.msk.bf16.vlgmr.msra.gmra.mxu0 %vm58_vm0, %v21_v29  ;;  %271 = vmatpush.bf16.msra.mxu3 %v755_v47  ;;  %v793_v6 = vld [vmem:[%s1049_s3 + $0xf8] sm:$0xff]  ;;  %v792_v7 = vld [vmem:[%s1049_s3 + $0xf0] sm:$0xff]  ;;  %v775_v9 = vld [vmem:[%s1049_s3 + $0x88] sm:$0xff] }
  0x14   :  { %322 = vmatpush.bf16.msrb.mxu0 %v663_v26  ;;  %583 = vmatmul.msk.bf16.vlgmr.msra.gmra.mxu1 %vm58_vm0, %v21_v29  ;;  %v776_v8 = vld [vmem:[%s1049_s3 + $0x90] sm:$0xff]  ;;  %v791_v10 = vld [vmem:[%s1049_s3 + $0xe8] sm:$0xff]  ;;  %v774_v11 = vld [vmem:[%s1049_s3 + $0x80] sm:$0xff] }
  0x15   :  { %397 = vmatpush.bf16.msrb.mxu1 %v781_v40  ;;  %v790_v12 = vld [vmem:[%s1049_s3 + $0xe0] sm:$0xff]  ;;  %v789_v13 = vld [vmem:[%s1049_s3 + $0xd8] sm:$0xff]  ;;  %v788_v14 = vld [vmem:[%s1049_s3 + $0xd0] sm:$0xff] }
  0x16   :  { %211 = vmatpush.bf16.msra.mxu2 %v766_v50  ;;  %v794_v15 = vld [vmem:[%s1047_s2] ss:$0 sm:$0xff]  ;;  %v795_v16 = vld [vmem:[%s1047_s2 + $0x1] ss:$0 sm:$0xff]  ;;  %v787_v17 = vld [vmem:[%s1049_s3 + $0xc8] sm:$0xff] }
  0x17   :  { %272 = vmatpush.bf16.msra.mxu3 %v754_v52  ;;  %v786_v23 = vld [vmem:[%s1049_s3 + $0xc0] sm:$0xff] }
  0x18   :  { %323 = vmatpush.bf16.msrb.mxu0 %v659_v30  ;;  %v798_v49 = vld [vmem:[%s1050_s4] ss:$0 sm:$0xff] }
  0x19   :  { %398 = vmatpush.bf16.msrb.mxu1 %v780_v43 }
  0x1a   :  { %212 = vmatpush.bf16.msra.mxu2 %v765_v55 }
  0x1b   :  { %273 = vmatpush.bf16.msra.mxu3 %v753_v57 }
  0x1c   :  { %324 = vmatpush.bf16.msrb.mxu0 %v655_v35  ;;  %v797_v35 = vld [vmem:[%s1047_s2 + $0x3] ss:$0 sm:$0xff] }
  0x1d   :  { %399 = vmatpush.bf16.msrb.mxu1 %v779_v1 }
  0x1e   :  { %213 = vmatpush.bf16.msra.mxu2 %v764_v60 }
  0x1f   :  { %274 = vmatpush.bf16.msra.mxu3 %v752_v62 }
  0x20   :  { %325 = vmatpush.bf16.msrb.mxu0 %v651_v44 }
  0x21   :  { %400 = vmatpush.bf16.msrb.mxu1 %v778_v4 }
  0x22   :  { %214 = vmatpush.bf16.msra.mxu2 %v763_v63 }
  0x23   :  { %664 = vmatmul.msk.bf16.vlgmr.msrb.gmra.mxu0 %vm58_vm0, %v21_v29  ;;  %275 = vmatpush.bf16.msra.mxu3 %v751_v0 }
  0x24   :  { %451 = vmatpush.bf16.msra.mxu0 %v712_v46 }
  0x25   :  { %401 = vmatpush.bf16.msrb.mxu1 %v777_v5 }
  0x26   :  { %215 = vmatpush.bf16.msra.mxu2 %v762_v2 }
  0x27   :  { %276 = vmatpush.bf16.msra.mxu3 %v750_v3 }
  0x28   :  { %452 = vmatpush.bf16.msra.mxu0 %v708_v51 }
  0x29   :  { %402 = vmatpush.bf16.msrb.mxu1 %v776_v8 }
  0x2a   :  { %526 = vmatpush.bf16.msrb.mxu2 %v793_v6 }
  0x2c   :  { %453 = vmatpush.bf16.msra.mxu0 %v704_v56 }
  0x2d   :  { %403 = vmatpush.bf16.msrb.mxu1 %v775_v9 }
  0x2e   :  { %527 = vmatpush.bf16.msrb.mxu2 %v792_v7 }
  0x30   :  { %454 = vmatpush.bf16.msra.mxu0 %v700_v61 }
  0x31   :  { %404 = vmatpush.bf16.msrb.mxu1 %v774_v11 }
  0x32   :  { %528 = vmatpush.bf16.msrb.mxu2 %v791_v10 }
  0x33   :  { %713 = vmatmul.msk.bf16.vlgmr.msra.gmra.mxu0 %vm58_vm0, %v21_v29  ;;  %v796_v29 = vld [vmem:[%s1047_s2 + $0x2] ss:$0 sm:$0xff] }
  0x36   :  { %529 = vmatpush.bf16.msrb.mxu2 %v790_v12 }
  0x3a   :  { %530 = vmatpush.bf16.msrb.mxu2 %v789_v13 }
  0x3e   :  { %531 = vmatpush.bf16.msrb.mxu2 %v788_v14 }
  0x42   :  { %532 = vmatpush.bf16.msrb.mxu2 %v787_v17 }
  0x46   :  { %533 = vmatpush.bf16.msrb.mxu2 %v786_v23 }
  0x90   :  { %v71_v18 = vpop.f32.mrf.mxu0 }
  0x91   :  { %v72_v19 = vadd.f32 %v794_v15, %v71_v18  ;;  %v138_v20 = vpop.f32.mrf.mxu1 }
  0x92   :  { %v139_v21 = vadd.f32 %v795_v16, %v138_v20 }
  0x93   :  { %v75_v22 = vmax.f32 %v72_v19, 0.0 }
  0x94   :  { %v142_v24 = vmax.f32 %v139_v21, 0.0 }
  0x95   :  { %v76_v25 = vpack.c.bf16 %v75_v22, %v75_v22 }
  0x96   :  { %v143_v26 = vpack.c.bf16 %v142_v24, %v142_v24 }
  0x97   :  { %277 = vmatmul.bf16.vlgmr.msra.gmra.mxu3 %v76_v25 }
  0x98   :  { %216 = vmatmul.bf16.vlgmr.msra.gmra.mxu2 %v143_v26  ;;  %v73_v27 = vpop.f32.mrf.mxu0 }
  0x99   :  { %v140_v28 = vpop.f32.mrf.mxu1 }
  0xa0   :  { %v327_v30 = vpop.f32.mrf.mxu0 }
  0xa1   :  { %v328_v31 = vadd.f32 %v796_v29, %v327_v30 }
  0xa3   :  { %v331_v32 = vmax.f32 %v328_v31, 0.0 }
  0xa5   :  { %v332_v33 = vpack.c.bf16 %v331_v32, %v331_v32 }
  0xa7   :  { %405 = vmatmul.bf16.vlgmr.msrb.gmra.mxu1 %v332_v33 }
  0xa8   :  { %v329_v34 = vpop.f32.mrf.mxu0 }
  0xb0   :  { %v456_v36 = vpop.f32.mrf.mxu0 }
  0xb1   :  { %v457_v37 = vadd.f32 %v797_v35, %v456_v36 }
  0xb3   :  { %v460_v38 = vmax.f32 %v457_v37, 0.0 }
  0xb5   :  { %v461_v39 = vpack.c.bf16 %v460_v38, %v460_v38 }
  0xb7   :  { %534 = vmatmul.bf16.vlgmr.msrb.gmra.mxu2 %v461_v39 }
  0xb8   :  { %v458_v40 = vpop.f32.mrf.mxu0 }
 0x11a   :  { %v278_v41 = vpop.f32.mrf.mxu3 }
 0x11b   :  { %v217_v42 = vpop.f32.mrf.mxu2 }
 0x11c   :  { %v279_v47 = vadd.f32 %v278_v41, %v217_v42 }
 0x122   :  { %v280_v43 = vpop.f32.mrf.mxu3 }
 0x123   :  { %v219_v44 = vpop.f32.mrf.mxu2 }
 0x124   :  { %v406_v45 = vpop.f32.mrf.mxu1 }
 0x125   :  { %v410_v48 = vadd.f32 %v406_v45, %v279_v47 }
 0x12c   :  { %v408_v46 = vpop.f32.mrf.mxu1 }
 0x13a   :  { %v535_v50 = vpop.f32.mrf.mxu2 }
 0x13b   :  { %v539_v51 = vadd.f32 %v535_v50, %v410_v48 }
 0x13d   :  { %v544_v52 = vadd.f32 %v798_v49, %v539_v51 }
 0x13f   :  { %545 = vst [vmem:[%s1051_s5] sm:$0x3] %v544_v52 }
 0x142   :  { %v537_v53 = vpop.f32.mrf.mxu2 }

</bundles_post_ra>
